<compile_context>
chip_gen: v5e
topology: v5e:2x2
jax: 0.10.0
libtpu: 0.0.40
codegen_flags: <defaults>
</compile_context>

<pallas_src>
import functools

import jax
import jax.numpy as jnp
import numpy as np
from jax.experimental import pallas as pl
from jax.experimental.pallas import tpu as pltpu

EPS = 1e-5                 # nn.BatchNorm2d default eps
LANE = 128                 # TPU lane width
_PREC = jax.lax.Precision.HIGHEST   # reference only


# --------------------------------------------------------------------- compiler params ---
@functools.lru_cache(maxsize=None)
def _vmem_limit_bytes():
    """Generation-aware VMEM budget: ~3/4 of physical (96 MiB on v5e/v6e, 48 MiB on
    v7x's 64 MiB per-TC VMEM); conservative fallback if the query is unavailable."""
    try:
        info = pltpu.get_tpu_info()
        for name in ("vmem_capacity_bytes", "vmem_size_bytes", "vmem_bytes"):
            cap = getattr(info, name, None)
            if cap:
                return int(min(int(cap) * 3 // 4, 96 * 1024 * 1024))
    except Exception:
        pass
    return 48 * 1024 * 1024


def _compiler_params():
    return pltpu.CompilerParams(
        dimension_semantics=("parallel",),       # independent row steps -> 2-TC splittable
        vmem_limit_bytes=_vmem_limit_bytes())


# ----------------------------------------------------------------------------- kernels ---
def _conv3x3_bn_kernel(x0_ref, x1_ref, x2_ref, w_ref, y_ref, s_ref,
                       *, n, wo, cin, plan):
    """One output row (all batch images, all Wo columns) of a 3x3 'same' convolution,
    computed as 9 accumulating bf16 MXU dots into an f32 accumulator.

      x{0,1,2}_ref : (n, wc, cg) bf16  -- the three padded input rows (dh = 0,1,2)
                                          feeding this output row.  For stride 2 the W
                                          axis was pre-grouped into channel pairs so
                                          each tap below is a unit-stride static slice.
      w_ref        : (9, cin, cw) bf16 -- per-tap weights (tap index = 3*dh + dw).
      y_ref        : (n, wo, cw) bf16  -- pre-BN conv output (bf16 store, f32 accumulate).
      s_ref        : (8, cw) f32       -- BN partials for this row (row0 sum, row1 sumsq).
    """
    rows = (x0_ref[...], x1_ref[...], x2_ref[...])
    acc = None
    for dh in range(3):
        row = rows[dh]
        for dw, (co, ch) in enumerate(plan):
            tap = row[:, co:co + wo, ch:ch + cin].reshape(n * wo, cin)
            part = jnp.dot(tap, w_ref[3 * dh + dw],
                           preferred_element_type=jnp.float32)
            acc = part if acc is None else acc + part
    cw = acc.shape[-1]
    y_ref[...] = acc.reshape(n, wo, cw).astype(y_ref.dtype)
    ssum = jnp.sum(acc, axis=0, keepdims=True)
    ssq = jnp.sum(acc * acc, axis=0, keepdims=True)
    s_ref[...] = jnp.concatenate([ssum, ssq, jnp.zeros((6, cw), jnp.float32)], axis=0)


def _affine_relu_pad_kernel(y_ref, sc_ref, sh_ref, o_ref, *, n, ho, wo, wp2):
    """relu(bn1(conv1)) for one row, written directly into the zero-padded
    (Ho+2, Wo+2) layout that conv2 consumes (boundary rows/columns are zeros)."""
    hp = pl.program_id(0)
    interior = jnp.logical_and(hp >= 1, hp <= ho)
    h = jnp.maximum(y_ref[...].astype(jnp.float32) * sc_ref[...] + sh_ref[...], 0.0)
    h = jnp.where(interior, h, jnp.zeros_like(h))
    c = h.shape[-1]
    zl = jnp.zeros((n, 1, c), jnp.float32)
    zr = jnp.zeros((n, wp2 - wo - 1, c), jnp.float32)
    o_ref[...] = jnp.concatenate([zl, h, zr], axis=1).astype(o_ref.dtype)


def _finalize_id_kernel(y_ref, sc_ref, sh_ref, id_ref, o_ref):
    """bn2(conv2) + identity (in_channels == out_channels path); bf16 lane-dense store."""
    out = y_ref[...].astype(jnp.float32) * sc_ref[...] + sh_ref[...]
    o_ref[...] = (out + id_ref[...].astype(jnp.float32)).astype(o_ref.dtype)


def _finalize_ds_kernel(y_ref, sc_ref, sh_ref, z_ref, scd_ref, shd_ref, o_ref):
    """bn2(conv2) + bn_ds(1x1 conv) (downsample path, z was folded into conv1's output)."""
    out = y_ref[...].astype(jnp.float32) * sc_ref[...] + sh_ref[...]
    out = out + z_ref[...].astype(jnp.float32) * scd_ref[...] + shd_ref[...]
    o_ref[...] = out.astype(o_ref.dtype)


# ------------------------------------------------------------------------ pallas calls ---
def _conv3x3_bn(xg, w_taps, *, stride, n, ho, wo, cin, plan):
    """Fused 3x3 conv (+ optional folded 1x1 downsample columns) with per-row BN partials."""
    wc, cg = xg.shape[2], xg.shape[3]
    cw = w_taps.shape[-1]
    kern = functools.partial(_conv3x3_bn_kernel, n=n, wo=wo, cin=cin, plan=plan)
    row_specs = [
        pl.BlockSpec((n, None, wc, cg),
                     lambda h, dh=dh: (0, stride * h + dh, 0, 0))   # 1-row halo per tap
        for dh in range(3)
    ]
    return pl.pallas_call(
        kern,
        out_shape=(jax.ShapeDtypeStruct((n, ho, wo, cw), jnp.bfloat16),
                   jax.ShapeDtypeStruct((ho * 8, cw), jnp.float32)),
        grid=(ho,),
        in_specs=row_specs + [pl.BlockSpec((9, cin, cw), lambda h: (0, 0, 0))],
        out_specs=(pl.BlockSpec((n, None, wo, cw), lambda h: (0, h, 0, 0)),
                   pl.BlockSpec((8, cw), lambda h: (h, 0))),
        compiler_params=_compiler_params(),
    )(xg, xg, xg, w_taps)


def _affine_relu_pad(y, sc, sh, *, n, ho, wo, cpad):
    wp2 = wo + 2
    kern = functools.partial(_affine_relu_pad_kernel, n=n, ho=ho, wo=wo, wp2=wp2)
    return pl.pallas_call(
        kern,
        out_shape=jax.ShapeDtypeStruct((n, ho + 2, wp2, cpad), jnp.bfloat16),
        grid=(ho + 2,),
        in_specs=[pl.BlockSpec(
                      (n, None, wo, cpad),
                      lambda hp: (0, jnp.minimum(jnp.maximum(hp - 1, 0), ho - 1), 0, 0)),
                  pl.BlockSpec((1, cpad), lambda hp: (0, 0)),
                  pl.BlockSpec((1, cpad), lambda hp: (0, 0))],
        out_specs=pl.BlockSpec((n, None, wp2, cpad), lambda hp: (0, hp, 0, 0)),
        compiler_params=_compiler_params(),
    )(y, sc, sh)


def _finalize_identity(y2, sc2, sh2, ident, *, n, ho, wo, cpad):
    return pl.pallas_call(
        _finalize_id_kernel,
        out_shape=jax.ShapeDtypeStruct((n, ho, wo, cpad), jnp.bfloat16),
        grid=(ho,),
        in_specs=[pl.BlockSpec((n, None, wo, cpad), lambda h: (0, h, 0, 0)),
                  pl.BlockSpec((1, cpad), lambda h: (0, 0)),
                  pl.BlockSpec((1, cpad), lambda h: (0, 0)),
                  pl.BlockSpec((n, None, wo, cpad), lambda h: (0, h, 0, 0))],
        out_specs=pl.BlockSpec((n, None, wo, cpad), lambda h: (0, h, 0, 0)),
        compiler_params=_compiler_params(),
    )(y2, sc2, sh2, ident)


def _finalize_downsample(y2, sc2, sh2, y1c, scd, shd, *, n, ho, wo, cpad):
    return pl.pallas_call(
        _finalize_ds_kernel,
        out_shape=jax.ShapeDtypeStruct((n, ho, wo, cpad), jnp.bfloat16),
        grid=(ho,),
        in_specs=[pl.BlockSpec((n, None, wo, cpad), lambda h: (0, h, 0, 0)),
                  pl.BlockSpec((1, cpad), lambda h: (0, 0)),
                  pl.BlockSpec((1, cpad), lambda h: (0, 0)),
                  # downsample branch = channel-block 1 of conv1's widened output
                  pl.BlockSpec((n, None, wo, cpad), lambda h: (0, h, 0, 1)),
                  pl.BlockSpec((1, cpad), lambda h: (0, 0)),
                  pl.BlockSpec((1, cpad), lambda h: (0, 0))],
        out_specs=pl.BlockSpec((n, None, wo, cpad), lambda h: (0, h, 0, 0)),
        compiler_params=_compiler_params(),
    )(y2, sc2, sh2, y1c, scd, shd)


# -------------------------------------------------------------------------------- glue ---
def _round_up(x, m):
    return ((x + m - 1) // m) * m


def _pad_vec(v, c_pad, fill):
    return jnp.pad(v.astype(jnp.float32), (0, c_pad - v.shape[0]), constant_values=fill)


def _w3x3_taps(w_oihw, cpad):
    cout, cin = w_oihw.shape[0], w_oihw.shape[1]
    w = jnp.transpose(w_oihw, (2, 3, 1, 0)).reshape(9, cin, cout)   # (kh*kw, cin, cout)
    return jnp.pad(w, ((0, 0), (0, 0), (0, cpad - cout))).astype(jnp.bfloat16)


def _w1x1_center_taps(w_oihw, cpad):
    cout, cin = w_oihw.shape[0], w_oihw.shape[1]
    w = jnp.transpose(w_oihw, (2, 3, 1, 0)).reshape(1, cin, cout)
    # 1x1 stride-s conv == centre tap (kh=1, kw=1) of the 3x3 window.
    return jnp.pad(w, ((4, 4), (0, 0), (0, cpad - cout))).astype(jnp.bfloat16)


def _bn_coeffs(stats, m_real, gamma, beta, cpad):
    """Combine per-row partial (sum, sumsq) -> per-channel affine scale/shift (training BN)."""
    s = stats.reshape(-1, 8, stats.shape[-1])
    total = jnp.sum(s[:, 0, :], axis=0)
    totsq = jnp.sum(s[:, 1, :], axis=0)
    mean = total / m_real
    var = jnp.maximum(totsq / m_real - mean * mean, 0.0)   # biased variance
    inv = jax.lax.rsqrt(var + EPS)
    scale = _pad_vec(gamma, cpad, 1.0) * inv
    shift = _pad_vec(beta, cpad, 0.0) - mean * scale
    return scale.reshape(1, cpad), shift.reshape(1, cpad)


def resnet_block_forward(x_nchw, params, stride=1):
    # TODO(synk): keep the whole network NHWC; this per-block NCHW<->NHWC pair should be
    # paid once at the model boundary only.
    x = jnp.transpose(x_nchw, (0, 2, 3, 1)).astype(jnp.bfloat16)
    n, h, w, cin = x.shape
    cout = params["w1"].shape[0]
    cpad = _round_up(cout, LANE)                 # lane-dense output channels
    ho = (h - 1) // stride + 1
    wo = (w - 1) // stride + 1
    m_real = n * ho * wo
    has_ds = "wd" in params

    # --- conv1 (3x3, stride, pad 1) [+ folded 1x1 downsample] + BN stats -------------
    wp = stride * wo + 2
    xp = jnp.pad(x, ((0, 0), (1, 1), (1, wp - w - 1), (0, 0)))
    if stride == 2:
        # Layout-preserving (free) reshape: adjacent column pairs become channel groups,
        # so every strided tap in the kernel is a plain unit-stride slice.
        xg = xp.reshape(n, h + 2, wp // 2, 2 * cin)
        plan1 = ((0, 0), (0, cin), (1, 0))       # (col, chan-group) offset per kw tap
    else:
        xg = xp
        plan1 = ((0, 0), (1, 0), (2, 0))

    w1 = _w3x3_taps(params["w1"], cpad)                      # (9, cin, cpad)
    if has_ds:
        wd = _w1x1_center_taps(params["wd"], cpad)           # (9, cin, cpad), centre tap only
        w1 = jnp.concatenate([w1, wd], axis=-1)              # fold ds as extra output cols
    y1, st1 = _conv3x3_bn(xg, w1, stride=stride, n=n, ho=ho, wo=wo, cin=cin, plan=plan1)
    sc1, sh1 = _bn_coeffs(st1[:, :cpad], m_real, params["g1"], params["b1"], cpad)

    # --- relu(bn1) fused with zero-pad embedding into conv2's input layout ------------
    hpad = _affine_relu_pad(y1, sc1, sh1, n=n, ho=ho, wo=wo, cpad=cpad)

    # --- conv2 (3x3, stride 1, pad 1) + BN stats ---------------------------------------
    w2 = _w3x3_taps(params["w2"], cpad)                      # (9, cout, cpad)
    y2, st2 = _conv3x3_bn(hpad, w2, stride=1, n=n, ho=ho, wo=wo, cin=cout,
                          plan=((0, 0), (1, 0), (2, 0)))
    sc2, sh2 = _bn_coeffs(st2, m_real, params["g2"], params["b2"], cpad)

    # --- bn2 + residual add -------------------------------------------------------------
    if has_ds:
        scd, shd = _bn_coeffs(st1[:, cpad:], m_real, params["gd"], params["bd"], cpad)
        out = _finalize_downsample(y2, sc2, sh2, y1, scd, shd,
                                   n=n, ho=ho, wo=wo, cpad=cpad)
    else:
        assert stride == 1, "identity add requires stride == 1 when in_channels == out_channels"
        ident = jnp.pad(x, ((0, 0), (0, 0), (0, 0), (0, cpad - cin)))
        out = _finalize_identity(y2, sc2, sh2, ident, n=n, ho=ho, wo=wo, cpad=cpad)

    out = out[:, :, :, :cout]
    return jnp.transpose(out, (0, 3, 1, 2)).astype(jnp.float32)   # NCHW, f32 at the boundary


resnet_block = jax.jit(resnet_block_forward, static_argnames=("stride",))


# ------------------------------------------------------------------------------ params ---
def init_params(key, in_channels, out_channels):
    ks = jax.random.split(key, 10)

    def w(k, shape, fan_in):
        v = jax.random.uniform(k, shape, jnp.float32, -1.0, 1.0) / np.sqrt(fan_in)
        return v.astype(jnp.bfloat16).astype(jnp.float32)   # bf16-exact weights

    p = {
        "w1": w(ks[0], (out_channels, in_channels, 3, 3), 9 * in_channels),
        "g1": 1.0 + 0.1 * jax.random.normal(ks[1], (out_channels,), jnp.float32),
        "b1": 0.1 * jax.random.normal(ks[2], (out_channels,), jnp.float32),
        "w2": w(ks[3], (out_channels, out_channels, 3, 3), 9 * out_channels),
        "g2": 1.0 + 0.1 * jax.random.normal(ks[4], (out_channels,), jnp.float32),
        "b2": 0.1 * jax.random.normal(ks[5], (out_channels,), jnp.float32),
    }
    if in_channels != out_channels:
        p["wd"] = w(ks[6], (out_channels, in_channels, 1, 1), in_channels)
        p["gd"] = 1.0 + 0.1 * jax.random.normal(ks[7], (out_channels,), jnp.float32)
        p["bd"] = 0.1 * jax.random.normal(ks[8], (out_channels,), jnp.float32)
    return p


# --------------------------------------------------------------------------- reference ---
def _reference(x_nchw, params, stride):
    x = x_nchw.astype(jnp.float32)

    def conv(h, w, s, pad):
        return jax.lax.conv_general_dilated(
            h, w, window_strides=(s, s), padding=((pad, pad), (pad, pad)),
            dimension_numbers=("NCHW", "OIHW", "NCHW"), precision=_PREC)

    def bn(h, g, b):
        m = jnp.mean(h, axis=(0, 2, 3), keepdims=True)
        v = jnp.mean((h - m) ** 2, axis=(0, 2, 3), keepdims=True)
        return (h - m) * jax.lax.rsqrt(v + EPS) * g.reshape(1, -1, 1, 1) + b.reshape(1, -1, 1, 1)

    out = jax.nn.relu(bn(conv(x, params["w1"], stride, 1), params["g1"], params["b1"]))
    out = bn(conv(out, params["w2"], 1, 1), params["g2"], params["b2"])
    if "wd" in params:
        identity = bn(conv(x, params["wd"], stride, 0), params["gd"], params["bd"])
    else:
        identity = x
    return out + identity


# -------------------------------------------------------------------------------- main ---
if __name__ == "__main__":
    key = jax.random.PRNGKey(0)
    kx, kp = jax.random.split(key)
    x = jax.random.normal(kx, (2, 4, 16, 16), jnp.float32)
    x = x.astype(jnp.bfloat16).astype(jnp.float32)   # keep inputs bf16-exact

    cases = [
        (4, 8, 2),   # in != out -> downsample (1x1 conv + BN) path, stride 2
        (4, 4, 1),   # in == out -> plain residual path
    ]
    for i, (cin, cout, stride) in enumerate(cases):
        params = init_params(jax.random.fold_in(kp, i), cin, cout)
        out = jax.block_until_ready(resnet_block(x, params, stride=stride))
        ref = jax.block_until_ready(_reference(x, params, stride))
        assert out.shape == ref.shape
        np.testing.assert_allclose(np.asarray(out), np.asarray(ref), atol=5e-2, rtol=5e-2)

    print("KERNEL_OK")
</pallas_src>

<mosaic_0001>
module attributes {stable_mosaic.version = 11 : i64} {
  func.func @_affine_relu_pad_kernel(%arg0: i32, %arg1: memref<2x1x8x128xbf16, #tpu.memory_space<vmem>>, %arg2: memref<1x128xf32, #tpu.memory_space<vmem>>, %arg3: memref<1x128xf32, #tpu.memory_space<vmem>>, %arg4: memref<2x1x10x128xbf16, #tpu.memory_space<vmem>>) attributes {dimension_semantics = [#tpu.dimension_semantics<parallel>], iteration_bounds = array<i64: 10>, scalar_prefetch = 0 : i64, scratch_operands = 0 : i64, tpu.core_type = #tpu.core_type<tc>, window_params = [{transform_indices = @transform_0, window_bounds = array<i64: 2, 1, 8, 128>}, {pipeline_mode = #tpu.pipeline_mode<synchronous>, transform_indices = @transform_1, window_bounds = array<i64: 1, 128>}, {pipeline_mode = #tpu.pipeline_mode<synchronous>, transform_indices = @transform_2, window_bounds = array<i64: 1, 128>}, {transform_indices = @transform_3, window_bounds = array<i64: 2, 1, 10, 128>}]} {
    %c1_i32 = arith.constant 1 : i32
    %0 = arith.cmpi sge, %arg0, %c1_i32 : i32
    %c8_i32 = arith.constant 8 : i32
    %1 = arith.cmpi sle, %arg0, %c8_i32 : i32
    %2 = arith.andi %0, %1 : i1
    %c0 = arith.constant 0 : index
    %c0_0 = arith.constant 0 : index
    %c0_1 = arith.constant 0 : index
    %c0_2 = arith.constant 0 : index
    %3 = vector.load %arg1[%c0, %c0_0, %c0_1, %c0_2] : memref<2x1x8x128xbf16, #tpu.memory_space<vmem>>, vector<2x1x8x128xbf16>
    %4 = vector.shape_cast %3 : vector<2x1x8x128xbf16> to vector<2x8x128xbf16>
    %5 = arith.extf %4 : vector<2x8x128xbf16> to vector<2x8x128xf32>
    %c0_3 = arith.constant 0 : index
    %c0_4 = arith.constant 0 : index
    %6 = vector.load %arg2[%c0_3, %c0_4] : memref<1x128xf32, #tpu.memory_space<vmem>>, vector<1x128xf32>
    %7 = vector.shape_cast %6 : vector<1x128xf32> to vector<1x1x128xf32>
    %8 = vector.broadcast %7 : vector<1x1x128xf32> to vector<2x8x128xf32>
    %9 = arith.mulf %5, %8 : vector<2x8x128xf32>
    %c0_5 = arith.constant 0 : index
    %c0_6 = arith.constant 0 : index
    %10 = vector.load %arg3[%c0_5, %c0_6] : memref<1x128xf32, #tpu.memory_space<vmem>>, vector<1x128xf32>
    %11 = vector.shape_cast %10 : vector<1x128xf32> to vector<1x1x128xf32>
    %12 = vector.broadcast %11 : vector<1x1x128xf32> to vector<2x8x128xf32>
    %13 = arith.addf %9, %12 : vector<2x8x128xf32>
    %cst = arith.constant 0.000000e+00 : f32
    %14 = vector.broadcast %cst : f32 to vector<2x8x128xf32>
    %15 = arith.maximumf %13, %14 : vector<2x8x128xf32>
    %cst_7 = arith.constant 0.000000e+00 : f32
    %16 = vector.broadcast %cst_7 : f32 to vector<2x8x128xf32>
    %17 = arith.select %2, %15, %16 : vector<2x8x128xf32>
    %cst_8 = arith.constant 0.000000e+00 : f32
    %18 = vector.broadcast %cst_8 : f32 to vector<2x1x128xf32>
    %cst_9 = arith.constant 0.000000e+00 : f32
    %19 = vector.broadcast %cst_9 : f32 to vector<2x1x128xf32>
    %20 = tpu.concatenate %18, %17, %19 in 1 : vector<2x1x128xf32>, vector<2x8x128xf32>, vector<2x1x128xf32> -> vector<2x10x128xf32>
    %21 = arith.truncf %20 : vector<2x10x128xf32> to vector<2x10x128xbf16>
    %c0_10 = arith.constant 0 : index
    %c0_11 = arith.constant 0 : index
    %c0_12 = arith.constant 0 : index
    %c0_13 = arith.constant 0 : index
    %22 = vector.load %arg4[%c0_10, %c0_11, %c0_12, %c0_13] : memref<2x1x10x128xbf16, #tpu.memory_space<vmem>>, vector<2x1x10x128xbf16>
    %23 = vector.shape_cast %22 : vector<2x1x10x128xbf16> to vector<2x10x128xbf16>
    %24 = vector.shape_cast %21 : vector<2x10x128xbf16> to vector<2x1x10x128xbf16>
    tpu.vector_store %arg4[%c0_10, %c0_11, %c0_12, %c0_13], %24 {strides = array<i32>} : memref<2x1x10x128xbf16, #tpu.memory_space<vmem>>, vector<2x1x10x128xbf16>,
    return
  }
  func.func @transform_0(%arg0: i32) -> (i32, i32, i32, i32) {
    %c1_i32 = arith.constant 1 : i32
    %0 = arith.subi %arg0, %c1_i32 : i32
    %c0_i32 = arith.constant 0 : i32
    %1 = arith.maxsi %0, %c0_i32 : i32
    %c7_i32 = arith.constant 7 : i32
    %2 = arith.minsi %1, %c7_i32 : i32
    %c0_i32_0 = arith.constant 0 : i32
    %c0_i32_1 = arith.constant 0 : i32
    %c0_i32_2 = arith.constant 0 : i32
    %c0_i32_3 = arith.constant 0 : i32
    return %c0_i32_0, %2, %c0_i32_1, %c0_i32_2 : i32, i32, i32, i32
  }
  func.func @transform_1(%arg0: i32) -> (i32, i32) {
    %c0_i32 = arith.constant 0 : i32
    %c0_i32_0 = arith.constant 0 : i32
    %c0_i32_1 = arith.constant 0 : i32
    return %c0_i32, %c0_i32_0 : i32, i32
  }
  func.func @transform_2(%arg0: i32) -> (i32, i32) {
    %c0_i32 = arith.constant 0 : i32
    %c0_i32_0 = arith.constant 0 : i32
    %c0_i32_1 = arith.constant 0 : i32
    return %c0_i32, %c0_i32_0 : i32, i32
  }
  func.func @transform_3(%arg0: i32) -> (i32, i32, i32, i32) {
    %c0_i32 = arith.constant 0 : i32
    %c0_i32_0 = arith.constant 0 : i32
    %c0_i32_1 = arith.constant 0 : i32
    %c0_i32_2 = arith.constant 0 : i32
    return %c0_i32, %arg0, %c0_i32_0, %c0_i32_1 : i32, i32, i32, i32
  }
}

module attributes {stable_mosaic.version = 11 : i64} {
  func.func @_conv3x3_bn_kernel(%arg0: i32, %arg1: memref<2x1x9x8xbf16, #tpu.memory_space<vmem>>, %arg2: memref<2x1x9x8xbf16, #tpu.memory_space<vmem>>, %arg3: memref<2x1x9x8xbf16, #tpu.memory_space<vmem>>, %arg4: memref<9x4x256xbf16, #tpu.memory_space<vmem>>, %arg5: memref<2x1x8x256xbf16, #tpu.memory_space<vmem>>, %arg6: memref<8x256xf32, #tpu.memory_space<vmem>>) attributes {dimension_semantics = [#tpu.dimension_semantics<parallel>], iteration_bounds = array<i64: 8>, scalar_prefetch = 0 : i64, scratch_operands = 0 : i64, tpu.core_type = #tpu.core_type<tc>, window_params = [{transform_indices = @transform_0, window_bounds = array<i64: 2, 1, 9, 8>}, {transform_indices = @transform_1, window_bounds = array<i64: 2, 1, 9, 8>}, {transform_indices = @transform_2, window_bounds = array<i64: 2, 1, 9, 8>}, {pipeline_mode = #tpu.pipeline_mode<synchronous>, transform_indices = @transform_3, window_bounds = array<i64: 9, 4, 256>}, {transform_indices = @transform_4, window_bounds = array<i64: 2, 1, 8, 256>}, {transform_indices = @transform_5, window_bounds = array<i64: 8, 256>}]} {
    %c0 = arith.constant 0 : index
    %c0_0 = arith.constant 0 : index
    %c0_1 = arith.constant 0 : index
    %c0_2 = arith.constant 0 : index
    %0 = vector.load %arg1[%c0, %c0_0, %c0_1, %c0_2] : memref<2x1x9x8xbf16, #tpu.memory_space<vmem>>, vector<2x1x9x8xbf16>
    %1 = vector.shape_cast %0 : vector<2x1x9x8xbf16> to vector<2x9x8xbf16>
    %c0_3 = arith.constant 0 : index
    %c0_4 = arith.constant 0 : index
    %c0_5 = arith.constant 0 : index
    %c0_6 = arith.constant 0 : index
    %2 = vector.load %arg2[%c0_3, %c0_4, %c0_5, %c0_6] : memref<2x1x9x8xbf16, #tpu.memory_space<vmem>>, vector<2x1x9x8xbf16>
    %3 = vector.shape_cast %2 : vector<2x1x9x8xbf16> to vector<2x9x8xbf16>
    %c0_7 = arith.constant 0 : index
    %c0_8 = arith.constant 0 : index
    %c0_9 = arith.constant 0 : index
    %c0_10 = arith.constant 0 : index
    %4 = vector.load %arg3[%c0_7, %c0_8, %c0_9, %c0_10] : memref<2x1x9x8xbf16, #tpu.memory_space<vmem>>, vector<2x1x9x8xbf16>
    %5 = vector.shape_cast %4 : vector<2x1x9x8xbf16> to vector<2x9x8xbf16>
    %6 = vector.extract_strided_slice %1 {offsets = [0, 0, 0], sizes = [2, 8, 4], strides = [1, 1, 1]} : vector<2x9x8xbf16> to vector<2x8x4xbf16>
    %7 = vector.shape_cast %6 : vector<2x8x4xbf16> to vector<16x4xbf16>
    %c0_11 = arith.constant 0 : index
    %c0_12 = arith.constant 0 : index
    %c0_13 = arith.constant 0 : index
    %8 = vector.load %arg4[%c0_11, %c0_12, %c0_13] : memref<9x4x256xbf16, #tpu.memory_space<vmem>>, vector<1x4x256xbf16>
    %9 = vector.shape_cast %8 : vector<1x4x256xbf16> to vector<4x256xbf16>
    %cst = arith.constant dense<0.000000e+00> : vector<16x256xf32>
    %10 = tpu.matmul %7, %9, %cst {dimension_numbers = #tpu.dot_dimension_numbers<[1], [0], [0], [1], [0, 0, 1, 1], [], []>} : vector<16x4xbf16>, vector<4x256xbf16>, vector<16x256xf32> -> vector<16x256xf32>
    %11 = vector.extract_strided_slice %1 {offsets = [0, 0, 4], sizes = [2, 8, 4], strides = [1, 1, 1]} : vector<2x9x8xbf16> to vector<2x8x4xbf16>
    %12 = vector.shape_cast %11 : vector<2x8x4xbf16> to vector<16x4xbf16>
    %c1 = arith.constant 1 : index
    %c0_14 = arith.constant 0 : index
    %c0_15 = arith.constant 0 : index
    %13 = vector.load %arg4[%c1, %c0_14, %c0_15] : memref<9x4x256xbf16, #tpu.memory_space<vmem>>, vector<1x4x256xbf16>
    %14 = vector.shape_cast %13 : vector<1x4x256xbf16> to vector<4x256xbf16>
    %cst_16 = arith.constant dense<0.000000e+00> : vector<16x256xf32>
    %15 = tpu.matmul %12, %14, %cst_16 {dimension_numbers = #tpu.dot_dimension_numbers<[1], [0], [0], [1], [0, 0, 1, 1], [], []>} : vector<16x4xbf16>, vector<4x256xbf16>, vector<16x256xf32> -> vector<16x256xf32>
    %16 = arith.addf %10, %15 : vector<16x256xf32>
    %17 = vector.extract_strided_slice %1 {offsets = [0, 1, 0], sizes = [2, 8, 4], strides = [1, 1, 1]} : vector<2x9x8xbf16> to vector<2x8x4xbf16>
    %18 = vector.shape_cast %17 : vector<2x8x4xbf16> to vector<16x4xbf16>
    %c2 = arith.constant 2 : index
    %c0_17 = arith.constant 0 : index
    %c0_18 = arith.constant 0 : index
    %19 = vector.load %arg4[%c2, %c0_17, %c0_18] : memref<9x4x256xbf16, #tpu.memory_space<vmem>>, vector<1x4x256xbf16>
    %20 = vector.shape_cast %19 : vector<1x4x256xbf16> to vector<4x256xbf16>
    %cst_19 = arith.constant dense<0.000000e+00> : vector<16x256xf32>
    %21 = tpu.matmul %18, %20, %cst_19 {dimension_numbers = #tpu.dot_dimension_numbers<[1], [0], [0], [1], [0, 0, 1, 1], [], []>} : vector<16x4xbf16>, vector<4x256xbf16>, vector<16x256xf32> -> vector<16x256xf32>
    %22 = arith.addf %16, %21 : vector<16x256xf32>
    %23 = vector.extract_strided_slice %3 {offsets = [0, 0, 0], sizes = [2, 8, 4], strides = [1, 1, 1]} : vector<2x9x8xbf16> to vector<2x8x4xbf16>
    %24 = vector.shape_cast %23 : vector<2x8x4xbf16> to vector<16x4xbf16>
    %c3 = arith.constant 3 : index
    %c0_20 = arith.constant 0 : index
    %c0_21 = arith.constant 0 : index
    %25 = vector.load %arg4[%c3, %c0_20, %c0_21] : memref<9x4x256xbf16, #tpu.memory_space<vmem>>, vector<1x4x256xbf16>
    %26 = vector.shape_cast %25 : vector<1x4x256xbf16> to vector<4x256xbf16>
    %cst_22 = arith.constant dense<0.000000e+00> : vector<16x256xf32>
    %27 = tpu.matmul %24, %26, %cst_22 {dimension_numbers = #tpu.dot_dimension_numbers<[1], [0], [0], [1], [0, 0, 1, 1], [], []>} : vector<16x4xbf16>, vector<4x256xbf16>, vector<16x256xf32> -> vector<16x256xf32>
    %28 = arith.addf %22, %27 : vector<16x256xf32>
    %29 = vector.extract_strided_slice %3 {offsets = [0, 0, 4], sizes = [2, 8, 4], strides = [1, 1, 1]} : vector<2x9x8xbf16> to vector<2x8x4xbf16>
    %30 = vector.shape_cast %29 : vector<2x8x4xbf16> to vector<16x4xbf16>
    %c4 = arith.constant 4 : index
    %c0_23 = arith.constant 0 : index
    %c0_24 = arith.constant 0 : index
    %31 = vector.load %arg4[%c4, %c0_23, %c0_24] : memref<9x4x256xbf16, #tpu.memory_space<vmem>>, vector<1x4x256xbf16>
    %32 = vector.shape_cast %31 : vector<1x4x256xbf16> to vector<4x256xbf16>
    %cst_25 = arith.constant dense<0.000000e+00> : vector<16x256xf32>
    %33 = tpu.matmul %30, %32, %cst_25 {dimension_numbers = #tpu.dot_dimension_numbers<[1], [0], [0], [1], [0, 0, 1, 1], [], []>} : vector<16x4xbf16>, vector<4x256xbf16>, vector<16x256xf32> -> vector<16x256xf32>
    %34 = arith.addf %28, %33 : vector<16x256xf32>
    %35 = vector.extract_strided_slice %3 {offsets = [0, 1, 0], sizes = [2, 8, 4], strides = [1, 1, 1]} : vector<2x9x8xbf16> to vector<2x8x4xbf16>
    %36 = vector.shape_cast %35 : vector<2x8x4xbf16> to vector<16x4xbf16>
    %c5 = arith.constant 5 : index
    %c0_26 = arith.constant 0 : index
    %c0_27 = arith.constant 0 : index
    %37 = vector.load %arg4[%c5, %c0_26, %c0_27] : memref<9x4x256xbf16, #tpu.memory_space<vmem>>, vector<1x4x256xbf16>
    %38 = vector.shape_cast %37 : vector<1x4x256xbf16> to vector<4x256xbf16>
    %cst_28 = arith.constant dense<0.000000e+00> : vector<16x256xf32>
    %39 = tpu.matmul %36, %38, %cst_28 {dimension_numbers = #tpu.dot_dimension_numbers<[1], [0], [0], [1], [0, 0, 1, 1], [], []>} : vector<16x4xbf16>, vector<4x256xbf16>, vector<16x256xf32> -> vector<16x256xf32>
    %40 = arith.addf %34, %39 : vector<16x256xf32>
    %41 = vector.extract_strided_slice %5 {offsets = [0, 0, 0], sizes = [2, 8, 4], strides = [1, 1, 1]} : vector<2x9x8xbf16> to vector<2x8x4xbf16>
    %42 = vector.shape_cast %41 : vector<2x8x4xbf16> to vector<16x4xbf16>
    %c6 = arith.constant 6 : index
    %c0_29 = arith.constant 0 : index
    %c0_30 = arith.constant 0 : index
    %43 = vector.load %arg4[%c6, %c0_29, %c0_30] : memref<9x4x256xbf16, #tpu.memory_space<vmem>>, vector<1x4x256xbf16>
    %44 = vector.shape_cast %43 : vector<1x4x256xbf16> to vector<4x256xbf16>
    %cst_31 = arith.constant dense<0.000000e+00> : vector<16x256xf32>
    %45 = tpu.matmul %42, %44, %cst_31 {dimension_numbers = #tpu.dot_dimension_numbers<[1], [0], [0], [1], [0, 0, 1, 1], [], []>} : vector<16x4xbf16>, vector<4x256xbf16>, vector<16x256xf32> -> vector<16x256xf32>
    %46 = arith.addf %40, %45 : vector<16x256xf32>
    %47 = vector.extract_strided_slice %5 {offsets = [0, 0, 4], sizes = [2, 8, 4], strides = [1, 1, 1]} : vector<2x9x8xbf16> to vector<2x8x4xbf16>
    %48 = vector.shape_cast %47 : vector<2x8x4xbf16> to vector<16x4xbf16>
    %c7 = arith.constant 7 : index
    %c0_32 = arith.constant 0 : index
    %c0_33 = arith.constant 0 : index
    %49 = vector.load %arg4[%c7, %c0_32, %c0_33] : memref<9x4x256xbf16, #tpu.memory_space<vmem>>, vector<1x4x256xbf16>
    %50 = vector.shape_cast %49 : vector<1x4x256xbf16> to vector<4x256xbf16>
    %cst_34 = arith.constant dense<0.000000e+00> : vector<16x256xf32>
    %51 = tpu.matmul %48, %50, %cst_34 {dimension_numbers = #tpu.dot_dimension_numbers<[1], [0], [0], [1], [0, 0, 1, 1], [], []>} : vector<16x4xbf16>, vector<4x256xbf16>, vector<16x256xf32> -> vector<16x256xf32>
    %52 = arith.addf %46, %51 : vector<16x256xf32>
    %53 = vector.extract_strided_slice %5 {offsets = [0, 1, 0], sizes = [2, 8, 4], strides = [1, 1, 1]} : vector<2x9x8xbf16> to vector<2x8x4xbf16>
    %54 = vector.shape_cast %53 : vector<2x8x4xbf16> to vector<16x4xbf16>
    %c8 = arith.constant 8 : index
    %c0_35 = arith.constant 0 : index
    %c0_36 = arith.constant 0 : index
    %55 = vector.load %arg4[%c8, %c0_35, %c0_36] : memref<9x4x256xbf16, #tpu.memory_space<vmem>>, vector<1x4x256xbf16>
    %56 = vector.shape_cast %55 : vector<1x4x256xbf16> to vector<4x256xbf16>
    %cst_37 = arith.constant dense<0.000000e+00> : vector<16x256xf32>
    %57 = tpu.matmul %54, %56, %cst_37 {dimension_numbers = #tpu.dot_dimension_numbers<[1], [0], [0], [1], [0, 0, 1, 1], [], []>} : vector<16x4xbf16>, vector<4x256xbf16>, vector<16x256xf32> -> vector<16x256xf32>
    %58 = arith.addf %52, %57 : vector<16x256xf32>
    %59 = vector.shape_cast %58 : vector<16x256xf32> to vector<2x8x256xf32>
    %60 = arith.truncf %59 : vector<2x8x256xf32> to vector<2x8x256xbf16>
    %c0_38 = arith.constant 0 : index
    %c0_39 = arith.constant 0 : index
    %c0_40 = arith.constant 0 : index
    %c0_41 = arith.constant 0 : index
    %61 = vector.load %arg5[%c0_38, %c0_39, %c0_40, %c0_41] : memref<2x1x8x256xbf16, #tpu.memory_space<vmem>>, vector<2x1x8x256xbf16>
    %62 = vector.shape_cast %61 : vector<2x1x8x256xbf16> to vector<2x8x256xbf16>
    %63 = vector.shape_cast %60 : vector<2x8x256xbf16> to vector<2x1x8x256xbf16>
    tpu.vector_store %arg5[%c0_38, %c0_39, %c0_40, %c0_41], %63 {strides = array<i32>} : memref<2x1x8x256xbf16, #tpu.memory_space<vmem>>, vector<2x1x8x256xbf16>,
    %cst_42 = arith.constant dense<0.000000e+00> : vector<256xf32>
    %64 = vector.multi_reduction <add>, %58, %cst_42 [0] : vector<16x256xf32> to vector<256xf32>
    %65 = vector.shape_cast %64 : vector<256xf32> to vector<1x256xf32>
    %66 = arith.mulf %58, %58 : vector<16x256xf32>
    %cst_43 = arith.constant dense<0.000000e+00> : vector<256xf32>
    %67 = vector.multi_reduction <add>, %66, %cst_43 [0] : vector<16x256xf32> to vector<256xf32>
    %68 = vector.shape_cast %67 : vector<256xf32> to vector<1x256xf32>
    %cst_44 = arith.constant 0.000000e+00 : f32
    %69 = vector.broadcast %cst_44 : f32 to vector<6x256xf32>
    %70 = tpu.concatenate %65, %68, %69 in 0 : vector<1x256xf32>, vector<1x256xf32>, vector<6x256xf32> -> vector<8x256xf32>
    %c0_45 = arith.constant 0 : index
    %c0_46 = arith.constant 0 : index
    %71 = vector.load %arg6[%c0_45, %c0_46] : memref<8x256xf32, #tpu.memory_space<vmem>>, vector<8x256xf32>
    tpu.vector_store %arg6[%c0_45, %c0_46], %70 {strides = array<i32>} : memref<8x256xf32, #tpu.memory_space<vmem>>, vector<8x256xf32>,
    return
  }
  func.func @transform_0(%arg0: i32) -> (i32, i32, i32, i32) {
    %c2_i32 = arith.constant 2 : i32
    %0 = arith.muli %c2_i32, %arg0 : i32
    %c0_i32 = arith.constant 0 : i32
    %1 = arith.addi %0, %c0_i32 : i32
    %c0_i32_0 = arith.constant 0 : i32
    %c0_i32_1 = arith.constant 0 : i32
    %c0_i32_2 = arith.constant 0 : i32
    %c0_i32_3 = arith.constant 0 : i32
    return %c0_i32_0, %1, %c0_i32_1, %c0_i32_2 : i32, i32, i32, i32
  }
  func.func @transform_1(%arg0: i32) -> (i32, i32, i32, i32) {
    %c2_i32 = arith.constant 2 : i32
    %0 = arith.muli %c2_i32, %arg0 : i32
    %c1_i32 = arith.constant 1 : i32
    %1 = arith.addi %0, %c1_i32 : i32
    %c0_i32 = arith.constant 0 : i32
    %c0_i32_0 = arith.constant 0 : i32
    %c0_i32_1 = arith.constant 0 : i32
    %c0_i32_2 = arith.constant 0 : i32
    return %c0_i32, %1, %c0_i32_0, %c0_i32_1 : i32, i32, i32, i32
  }
  func.func @transform_2(%arg0: i32) -> (i32, i32, i32, i32) {
    %c2_i32 = arith.constant 2 : i32
    %0 = arith.muli %c2_i32, %arg0 : i32
    %c2_i32_0 = arith.constant 2 : i32
    %1 = arith.addi %0, %c2_i32_0 : i32
    %c0_i32 = arith.constant 0 : i32
    %c0_i32_1 = arith.constant 0 : i32
    %c0_i32_2 = arith.constant 0 : i32
    %c0_i32_3 = arith.constant 0 : i32
    return %c0_i32, %1, %c0_i32_1, %c0_i32_2 : i32, i32, i32, i32
  }
  func.func @transform_3(%arg0: i32) -> (i32, i32, i32) {
    %c0_i32 = arith.constant 0 : i32
    %c0_i32_0 = arith.constant 0 : i32
    %c0_i32_1 = arith.constant 0 : i32
    %c0_i32_2 = arith.constant 0 : i32
    return %c0_i32, %c0_i32_0, %c0_i32_1 : i32, i32, i32
  }
  func.func @transform_4(%arg0: i32) -> (i32, i32, i32, i32) {
    %c0_i32 = arith.constant 0 : i32
    %c0_i32_0 = arith.constant 0 : i32
    %c0_i32_1 = arith.constant 0 : i32
    %c0_i32_2 = arith.constant 0 : i32
    return %c0_i32, %arg0, %c0_i32_0, %c0_i32_1 : i32, i32, i32, i32
  }
  func.func @transform_5(%arg0: i32) -> (i32, i32) {
    %c0_i32 = arith.constant 0 : i32
    %c0_i32_0 = arith.constant 0 : i32
    return %arg0, %c0_i32 : i32, i32
  }
}

module attributes {stable_mosaic.version = 11 : i64} {
  func.func @_finalize_ds_kernel(%arg0: i32, %arg1: memref<2x1x8x128xbf16, #tpu.memory_space<vmem>>, %arg2: memref<1x128xf32, #tpu.memory_space<vmem>>, %arg3: memref<1x128xf32, #tpu.memory_space<vmem>>, %arg4: memref<2x1x8x128xbf16, #tpu.memory_space<vmem>>, %arg5: memref<1x128xf32, #tpu.memory_space<vmem>>, %arg6: memref<1x128xf32, #tpu.memory_space<vmem>>, %arg7: memref<2x1x8x128xbf16, #tpu.memory_space<vmem>>) attributes {dimension_semantics = [#tpu.dimension_semantics<parallel>], iteration_bounds = array<i64: 8>, scalar_prefetch = 0 : i64, scratch_operands = 0 : i64, tpu.core_type = #tpu.core_type<tc>, window_params = [{transform_indices = @transform_0, window_bounds = array<i64: 2, 1, 8, 128>}, {pipeline_mode = #tpu.pipeline_mode<synchronous>, transform_indices = @transform_1, window_bounds = array<i64: 1, 128>}, {pipeline_mode = #tpu.pipeline_mode<synchronous>, transform_indices = @transform_2, window_bounds = array<i64: 1, 128>}, {transform_indices = @transform_3, window_bounds = array<i64: 2, 1, 8, 128>}, {pipeline_mode = #tpu.pipeline_mode<synchronous>, transform_indices = @transform_4, window_bounds = array<i64: 1, 128>}, {pipeline_mode = #tpu.pipeline_mode<synchronous>, transform_indices = @transform_5, window_bounds = array<i64: 1, 128>}, {transform_indices = @transform_6, window_bounds = array<i64: 2, 1, 8, 128>}]} {
    %c0 = arith.constant 0 : index
    %c0_0 = arith.constant 0 : index
    %c0_1 = arith.constant 0 : index
    %c0_2 = arith.constant 0 : index
    %0 = vector.load %arg1[%c0, %c0_0, %c0_1, %c0_2] : memref<2x1x8x128xbf16, #tpu.memory_space<vmem>>, vector<2x1x8x128xbf16>
    %1 = vector.shape_cast %0 : vector<2x1x8x128xbf16> to vector<2x8x128xbf16>
    %2 = arith.extf %1 : vector<2x8x128xbf16> to vector<2x8x128xf32>
    %c0_3 = arith.constant 0 : index
    %c0_4 = arith.constant 0 : index
    %3 = vector.load %arg2[%c0_3, %c0_4] : memref<1x128xf32, #tpu.memory_space<vmem>>, vector<1x128xf32>
    %4 = vector.shape_cast %3 : vector<1x128xf32> to vector<1x1x128xf32>
    %5 = vector.broadcast %4 : vector<1x1x128xf32> to vector<2x8x128xf32>
    %6 = arith.mulf %2, %5 : vector<2x8x128xf32>
    %c0_5 = arith.constant 0 : index
    %c0_6 = arith.constant 0 : index
    %7 = vector.load %arg3[%c0_5, %c0_6] : memref<1x128xf32, #tpu.memory_space<vmem>>, vector<1x128xf32>
    %8 = vector.shape_cast %7 : vector<1x128xf32> to vector<1x1x128xf32>
    %9 = vector.broadcast %8 : vector<1x1x128xf32> to vector<2x8x128xf32>
    %10 = arith.addf %6, %9 : vector<2x8x128xf32>
    %c0_7 = arith.constant 0 : index
    %c0_8 = arith.constant 0 : index
    %c0_9 = arith.constant 0 : index
    %c0_10 = arith.constant 0 : index
    %11 = vector.load %arg4[%c0_7, %c0_8, %c0_9, %c0_10] : memref<2x1x8x128xbf16, #tpu.memory_space<vmem>>, vector<2x1x8x128xbf16>
    %12 = vector.shape_cast %11 : vector<2x1x8x128xbf16> to vector<2x8x128xbf16>
    %13 = arith.extf %12 : vector<2x8x128xbf16> to vector<2x8x128xf32>
    %c0_11 = arith.constant 0 : index
    %c0_12 = arith.constant 0 : index
    %14 = vector.load %arg5[%c0_11, %c0_12] : memref<1x128xf32, #tpu.memory_space<vmem>>, vector<1x128xf32>
    %15 = vector.shape_cast %14 : vector<1x128xf32> to vector<1x1x128xf32>
    %16 = vector.broadcast %15 : vector<1x1x128xf32> to vector<2x8x128xf32>
    %17 = arith.mulf %13, %16 : vector<2x8x128xf32>
    %18 = arith.addf %10, %17 : vector<2x8x128xf32>
    %c0_13 = arith.constant 0 : index
    %c0_14 = arith.constant 0 : index
    %19 = vector.load %arg6[%c0_13, %c0_14] : memref<1x128xf32, #tpu.memory_space<vmem>>, vector<1x128xf32>
    %20 = vector.shape_cast %19 : vector<1x128xf32> to vector<1x1x128xf32>
    %21 = vector.broadcast %20 : vector<1x1x128xf32> to vector<2x8x128xf32>
    %22 = arith.addf %18, %21 : vector<2x8x128xf32>
    %23 = arith.truncf %22 : vector<2x8x128xf32> to vector<2x8x128xbf16>
    %c0_15 = arith.constant 0 : index
    %c0_16 = arith.constant 0 : index
    %c0_17 = arith.constant 0 : index
    %c0_18 = arith.constant 0 : index
    %24 = vector.load %arg7[%c0_15, %c0_16, %c0_17, %c0_18] : memref<2x1x8x128xbf16, #tpu.memory_space<vmem>>, vector<2x1x8x128xbf16>
    %25 = vector.shape_cast %24 : vector<2x1x8x128xbf16> to vector<2x8x128xbf16>
    %26 = vector.shape_cast %23 : vector<2x8x128xbf16> to vector<2x1x8x128xbf16>
    tpu.vector_store %arg7[%c0_15, %c0_16, %c0_17, %c0_18], %26 {strides = array<i32>} : memref<2x1x8x128xbf16, #tpu.memory_space<vmem>>, vector<2x1x8x128xbf16>,
    return
  }
  func.func @transform_0(%arg0: i32) -> (i32, i32, i32, i32) {
    %c0_i32 = arith.constant 0 : i32
    %c0_i32_0 = arith.constant 0 : i32
    %c0_i32_1 = arith.constant 0 : i32
    %c0_i32_2 = arith.constant 0 : i32
    return %c0_i32, %arg0, %c0_i32_0, %c0_i32_1 : i32, i32, i32, i32
  }
  func.func @transform_1(%arg0: i32) -> (i32, i32) {
    %c0_i32 = arith.constant 0 : i32
    %c0_i32_0 = arith.constant 0 : i32
    %c0_i32_1 = arith.constant 0 : i32
    return %c0_i32, %c0_i32_0 : i32, i32
  }
  func.func @transform_2(%arg0: i32) -> (i32, i32) {
    %c0_i32 = arith.constant 0 : i32
    %c0_i32_0 = arith.constant 0 : i32
    %c0_i32_1 = arith.constant 0 : i32
    return %c0_i32, %c0_i32_0 : i32, i32
  }
  func.func @transform_3(%arg0: i32) -> (i32, i32, i32, i32) {
    %c0_i32 = arith.constant 0 : i32
    %c0_i32_0 = arith.constant 0 : i32
    %c1_i32 = arith.constant 1 : i32
    %c0_i32_1 = arith.constant 0 : i32
    return %c0_i32, %arg0, %c0_i32_0, %c1_i32 : i32, i32, i32, i32
  }
  func.func @transform_4(%arg0: i32) -> (i32, i32) {
    %c0_i32 = arith.constant 0 : i32
    %c0_i32_0 = arith.constant 0 : i32
    %c0_i32_1 = arith.constant 0 : i32
    return %c0_i32, %c0_i32_0 : i32, i32
  }
  func.func @transform_5(%arg0: i32) -> (i32, i32) {
    %c0_i32 = arith.constant 0 : i32
    %c0_i32_0 = arith.constant 0 : i32
    %c0_i32_1 = arith.constant 0 : i32
    return %c0_i32, %c0_i32_0 : i32, i32
  }
  func.func @transform_6(%arg0: i32) -> (i32, i32, i32, i32) {
    %c0_i32 = arith.constant 0 : i32
    %c0_i32_0 = arith.constant 0 : i32
    %c0_i32_1 = arith.constant 0 : i32
    %c0_i32_2 = arith.constant 0 : i32
    return %c0_i32, %arg0, %c0_i32_0, %c0_i32_1 : i32, i32, i32, i32
  }
}

module attributes {stable_mosaic.version = 11 : i64} {
  func.func @_conv3x3_bn_kernel(%arg0: i32, %arg1: memref<2x1x10x128xbf16, #tpu.memory_space<vmem>>, %arg2: memref<2x1x10x128xbf16, #tpu.memory_space<vmem>>, %arg3: memref<2x1x10x128xbf16, #tpu.memory_space<vmem>>, %arg4: memref<9x8x128xbf16, #tpu.memory_space<vmem>>, %arg5: memref<2x1x8x128xbf16, #tpu.memory_space<vmem>>, %arg6: memref<8x128xf32, #tpu.memory_space<vmem>>) attributes {dimension_semantics = [#tpu.dimension_semantics<parallel>], iteration_bounds = array<i64: 8>, scalar_prefetch = 0 : i64, scratch_operands = 0 : i64, tpu.core_type = #tpu.core_type<tc>, window_params = [{transform_indices = @transform_0, window_bounds = array<i64: 2, 1, 10, 128>}, {transform_indices = @transform_1, window_bounds = array<i64: 2, 1, 10, 128>}, {transform_indices = @transform_2, window_bounds = array<i64: 2, 1, 10, 128>}, {pipeline_mode = #tpu.pipeline_mode<synchronous>, transform_indices = @transform_3, window_bounds = array<i64: 9, 8, 128>}, {transform_indices = @transform_4, window_bounds = array<i64: 2, 1, 8, 128>}, {transform_indices = @transform_5, window_bounds = array<i64: 8, 128>}]} {
    %c0 = arith.constant 0 : index
    %c0_0 = arith.constant 0 : index
    %c0_1 = arith.constant 0 : index
    %c0_2 = arith.constant 0 : index
    %0 = vector.load %arg1[%c0, %c0_0, %c0_1, %c0_2] : memref<2x1x10x128xbf16, #tpu.memory_space<vmem>>, vector<2x1x10x128xbf16>
    %1 = vector.shape_cast %0 : vector<2x1x10x128xbf16> to vector<2x10x128xbf16>
    %c0_3 = arith.constant 0 : index
    %c0_4 = arith.constant 0 : index
    %c0_5 = arith.constant 0 : index
    %c0_6 = arith.constant 0 : index
    %2 = vector.load %arg2[%c0_3, %c0_4, %c0_5, %c0_6] : memref<2x1x10x128xbf16, #tpu.memory_space<vmem>>, vector<2x1x10x128xbf16>
    %3 = vector.shape_cast %2 : vector<2x1x10x128xbf16> to vector<2x10x128xbf16>
    %c0_7 = arith.constant 0 : index
    %c0_8 = arith.constant 0 : index
    %c0_9 = arith.constant 0 : index
    %c0_10 = arith.constant 0 : index
    %4 = vector.load %arg3[%c0_7, %c0_8, %c0_9, %c0_10] : memref<2x1x10x128xbf16, #tpu.memory_space<vmem>>, vector<2x1x10x128xbf16>
    %5 = vector.shape_cast %4 : vector<2x1x10x128xbf16> to vector<2x10x128xbf16>
    %6 = vector.extract_strided_slice %1 {offsets = [0, 0, 0], sizes = [2, 8, 8], strides = [1, 1, 1]} : vector<2x10x128xbf16> to vector<2x8x8xbf16>
    %7 = vector.shape_cast %6 : vector<2x8x8xbf16> to vector<16x8xbf16>
    %c0_11 = arith.constant 0 : index
    %c0_12 = arith.constant 0 : index
    %c0_13 = arith.constant 0 : index
    %8 = vector.load %arg4[%c0_11, %c0_12, %c0_13] : memref<9x8x128xbf16, #tpu.memory_space<vmem>>, vector<1x8x128xbf16>
    %9 = vector.shape_cast %8 : vector<1x8x128xbf16> to vector<8x128xbf16>
    %cst = arith.constant dense<0.000000e+00> : vector<16x128xf32>
    %10 = tpu.matmul %7, %9, %cst {dimension_numbers = #tpu.dot_dimension_numbers<[1], [0], [0], [1], [0, 0, 1, 1], [], []>} : vector<16x8xbf16>, vector<8x128xbf16>, vector<16x128xf32> -> vector<16x128xf32>
    %11 = vector.extract_strided_slice %1 {offsets = [0, 1, 0], sizes = [2, 8, 8], strides = [1, 1, 1]} : vector<2x10x128xbf16> to vector<2x8x8xbf16>
    %12 = vector.shape_cast %11 : vector<2x8x8xbf16> to vector<16x8xbf16>
    %c1 = arith.constant 1 : index
    %c0_14 = arith.constant 0 : index
    %c0_15 = arith.constant 0 : index
    %13 = vector.load %arg4[%c1, %c0_14, %c0_15] : memref<9x8x128xbf16, #tpu.memory_space<vmem>>, vector<1x8x128xbf16>
    %14 = vector.shape_cast %13 : vector<1x8x128xbf16> to vector<8x128xbf16>
    %cst_16 = arith.constant dense<0.000000e+00> : vector<16x128xf32>
    %15 = tpu.matmul %12, %14, %cst_16 {dimension_numbers = #tpu.dot_dimension_numbers<[1], [0], [0], [1], [0, 0, 1, 1], [], []>} : vector<16x8xbf16>, vector<8x128xbf16>, vector<16x128xf32> -> vector<16x128xf32>
    %16 = arith.addf %10, %15 : vector<16x128xf32>
    %17 = vector.extract_strided_slice %1 {offsets = [0, 2, 0], sizes = [2, 8, 8], strides = [1, 1, 1]} : vector<2x10x128xbf16> to vector<2x8x8xbf16>
    %18 = vector.shape_cast %17 : vector<2x8x8xbf16> to vector<16x8xbf16>
    %c2 = arith.constant 2 : index
    %c0_17 = arith.constant 0 : index
    %c0_18 = arith.constant 0 : index
    %19 = vector.load %arg4[%c2, %c0_17, %c0_18] : memref<9x8x128xbf16, #tpu.memory_space<vmem>>, vector<1x8x128xbf16>
    %20 = vector.shape_cast %19 : vector<1x8x128xbf16> to vector<8x128xbf16>
    %cst_19 = arith.constant dense<0.000000e+00> : vector<16x128xf32>
    %21 = tpu.matmul %18, %20, %cst_19 {dimension_numbers = #tpu.dot_dimension_numbers<[1], [0], [0], [1], [0, 0, 1, 1], [], []>} : vector<16x8xbf16>, vector<8x128xbf16>, vector<16x128xf32> -> vector<16x128xf32>
    %22 = arith.addf %16, %21 : vector<16x128xf32>
    %23 = vector.extract_strided_slice %3 {offsets = [0, 0, 0], sizes = [2, 8, 8], strides = [1, 1, 1]} : vector<2x10x128xbf16> to vector<2x8x8xbf16>
    %24 = vector.shape_cast %23 : vector<2x8x8xbf16> to vector<16x8xbf16>
    %c3 = arith.constant 3 : index
    %c0_20 = arith.constant 0 : index
    %c0_21 = arith.constant 0 : index
    %25 = vector.load %arg4[%c3, %c0_20, %c0_21] : memref<9x8x128xbf16, #tpu.memory_space<vmem>>, vector<1x8x128xbf16>
    %26 = vector.shape_cast %25 : vector<1x8x128xbf16> to vector<8x128xbf16>
    %cst_22 = arith.constant dense<0.000000e+00> : vector<16x128xf32>
    %27 = tpu.matmul %24, %26, %cst_22 {dimension_numbers = #tpu.dot_dimension_numbers<[1], [0], [0], [1], [0, 0, 1, 1], [], []>} : vector<16x8xbf16>, vector<8x128xbf16>, vector<16x128xf32> -> vector<16x128xf32>
    %28 = arith.addf %22, %27 : vector<16x128xf32>
    %29 = vector.extract_strided_slice %3 {offsets = [0, 1, 0], sizes = [2, 8, 8], strides = [1, 1, 1]} : vector<2x10x128xbf16> to vector<2x8x8xbf16>
    %30 = vector.shape_cast %29 : vector<2x8x8xbf16> to vector<16x8xbf16>
    %c4 = arith.constant 4 : index
    %c0_23 = arith.constant 0 : index
    %c0_24 = arith.constant 0 : index
    %31 = vector.load %arg4[%c4, %c0_23, %c0_24] : memref<9x8x128xbf16, #tpu.memory_space<vmem>>, vector<1x8x128xbf16>
    %32 = vector.shape_cast %31 : vector<1x8x128xbf16> to vector<8x128xbf16>
    %cst_25 = arith.constant dense<0.000000e+00> : vector<16x128xf32>
    %33 = tpu.matmul %30, %32, %cst_25 {dimension_numbers = #tpu.dot_dimension_numbers<[1], [0], [0], [1], [0, 0, 1, 1], [], []>} : vector<16x8xbf16>, vector<8x128xbf16>, vector<16x128xf32> -> vector<16x128xf32>
    %34 = arith.addf %28, %33 : vector<16x128xf32>
    %35 = vector.extract_strided_slice %3 {offsets = [0, 2, 0], sizes = [2, 8, 8], strides = [1, 1, 1]} : vector<2x10x128xbf16> to vector<2x8x8xbf16>
    %36 = vector.shape_cast %35 : vector<2x8x8xbf16> to vector<16x8xbf16>
    %c5 = arith.constant 5 : index
    %c0_26 = arith.constant 0 : index
    %c0_27 = arith.constant 0 : index
    %37 = vector.load %arg4[%c5, %c0_26, %c0_27] : memref<9x8x128xbf16, #tpu.memory_space<vmem>>, vector<1x8x128xbf16>
    %38 = vector.shape_cast %37 : vector<1x8x128xbf16> to vector<8x128xbf16>
    %cst_28 = arith.constant dense<0.000000e+00> : vector<16x128xf32>
    %39 = tpu.matmul %36, %38, %cst_28 {dimension_numbers = #tpu.dot_dimension_numbers<[1], [0], [0], [1], [0, 0, 1, 1], [], []>} : vector<16x8xbf16>, vector<8x128xbf16>, vector<16x128xf32> -> vector<16x128xf32>
    %40 = arith.addf %34, %39 : vector<16x128xf32>
    %41 = vector.extract_strided_slice %5 {offsets = [0, 0, 0], sizes = [2, 8, 8], strides = [1, 1, 1]} : vector<2x10x128xbf16> to vector<2x8x8xbf16>
    %42 = vector.shape_cast %41 : vector<2x8x8xbf16> to vector<16x8xbf16>
    %c6 = arith.constant 6 : index
    %c0_29 = arith.constant 0 : index
    %c0_30 = arith.constant 0 : index
    %43 = vector.load %arg4[%c6, %c0_29, %c0_30] : memref<9x8x128xbf16, #tpu.memory_space<vmem>>, vector<1x8x128xbf16>
    %44 = vector.shape_cast %43 : vector<1x8x128xbf16> to vector<8x128xbf16>
    %cst_31 = arith.constant dense<0.000000e+00> : vector<16x128xf32>
    %45 = tpu.matmul %42, %44, %cst_31 {dimension_numbers = #tpu.dot_dimension_numbers<[1], [0], [0], [1], [0, 0, 1, 1], [], []>} : vector<16x8xbf16>, vector<8x128xbf16>, vector<16x128xf32> -> vector<16x128xf32>
    %46 = arith.addf %40, %45 : vector<16x128xf32>
    %47 = vector.extract_strided_slice %5 {offsets = [0, 1, 0], sizes = [2, 8, 8], strides = [1, 1, 1]} : vector<2x10x128xbf16> to vector<2x8x8xbf16>
    %48 = vector.shape_cast %47 : vector<2x8x8xbf16> to vector<16x8xbf16>
    %c7 = arith.constant 7 : index
    %c0_32 = arith.constant 0 : index
    %c0_33 = arith.constant 0 : index
    %49 = vector.load %arg4[%c7, %c0_32, %c0_33] : memref<9x8x128xbf16, #tpu.memory_space<vmem>>, vector<1x8x128xbf16>
    %50 = vector.shape_cast %49 : vector<1x8x128xbf16> to vector<8x128xbf16>
    %cst_34 = arith.constant dense<0.000000e+00> : vector<16x128xf32>
    %51 = tpu.matmul %48, %50, %cst_34 {dimension_numbers = #tpu.dot_dimension_numbers<[1], [0], [0], [1], [0, 0, 1, 1], [], []>} : vector<16x8xbf16>, vector<8x128xbf16>, vector<16x128xf32> -> vector<16x128xf32>
    %52 = arith.addf %46, %51 : vector<16x128xf32>
    %53 = vector.extract_strided_slice %5 {offsets = [0, 2, 0], sizes = [2, 8, 8], strides = [1, 1, 1]} : vector<2x10x128xbf16> to vector<2x8x8xbf16>
    %54 = vector.shape_cast %53 : vector<2x8x8xbf16> to vector<16x8xbf16>
    %c8 = arith.constant 8 : index
    %c0_35 = arith.constant 0 : index
    %c0_36 = arith.constant 0 : index
    %55 = vector.load %arg4[%c8, %c0_35, %c0_36] : memref<9x8x128xbf16, #tpu.memory_space<vmem>>, vector<1x8x128xbf16>
    %56 = vector.shape_cast %55 : vector<1x8x128xbf16> to vector<8x128xbf16>
    %cst_37 = arith.constant dense<0.000000e+00> : vector<16x128xf32>
    %57 = tpu.matmul %54, %56, %cst_37 {dimension_numbers = #tpu.dot_dimension_numbers<[1], [0], [0], [1], [0, 0, 1, 1], [], []>} : vector<16x8xbf16>, vector<8x128xbf16>, vector<16x128xf32> -> vector<16x128xf32>
    %58 = arith.addf %52, %57 : vector<16x128xf32>
    %59 = vector.shape_cast %58 : vector<16x128xf32> to vector<2x8x128xf32>
    %60 = arith.truncf %59 : vector<2x8x128xf32> to vector<2x8x128xbf16>
    %c0_38 = arith.constant 0 : index
    %c0_39 = arith.constant 0 : index
    %c0_40 = arith.constant 0 : index
    %c0_41 = arith.constant 0 : index
    %61 = vector.load %arg5[%c0_38, %c0_39, %c0_40, %c0_41] : memref<2x1x8x128xbf16, #tpu.memory_space<vmem>>, vector<2x1x8x128xbf16>
    %62 = vector.shape_cast %61 : vector<2x1x8x128xbf16> to vector<2x8x128xbf16>
    %63 = vector.shape_cast %60 : vector<2x8x128xbf16> to vector<2x1x8x128xbf16>
    tpu.vector_store %arg5[%c0_38, %c0_39, %c0_40, %c0_41], %63 {strides = array<i32>} : memref<2x1x8x128xbf16, #tpu.memory_space<vmem>>, vector<2x1x8x128xbf16>,
    %cst_42 = arith.constant dense<0.000000e+00> : vector<128xf32>
    %64 = vector.multi_reduction <add>, %58, %cst_42 [0] : vector<16x128xf32> to vector<128xf32>
    %65 = vector.shape_cast %64 : vector<128xf32> to vector<1x128xf32>
    %66 = arith.mulf %58, %58 : vector<16x128xf32>
    %cst_43 = arith.constant dense<0.000000e+00> : vector<128xf32>
    %67 = vector.multi_reduction <add>, %66, %cst_43 [0] : vector<16x128xf32> to vector<128xf32>
    %68 = vector.shape_cast %67 : vector<128xf32> to vector<1x128xf32>
    %cst_44 = arith.constant 0.000000e+00 : f32
    %69 = vector.broadcast %cst_44 : f32 to vector<6x128xf32>
    %70 = tpu.concatenate %65, %68, %69 in 0 : vector<1x128xf32>, vector<1x128xf32>, vector<6x128xf32> -> vector<8x128xf32>
    %c0_45 = arith.constant 0 : index
    %c0_46 = arith.constant 0 : index
    %71 = vector.load %arg6[%c0_45, %c0_46] : memref<8x128xf32, #tpu.memory_space<vmem>>, vector<8x128xf32>
    tpu.vector_store %arg6[%c0_45, %c0_46], %70 {strides = array<i32>} : memref<8x128xf32, #tpu.memory_space<vmem>>, vector<8x128xf32>,
    return
  }
  func.func @transform_0(%arg0: i32) -> (i32, i32, i32, i32) {
    %c1_i32 = arith.constant 1 : i32
    %0 = arith.muli %c1_i32, %arg0 : i32
    %c0_i32 = arith.constant 0 : i32
    %1 = arith.addi %0, %c0_i32 : i32
    %c0_i32_0 = arith.constant 0 : i32
    %c0_i32_1 = arith.constant 0 : i32
    %c0_i32_2 = arith.constant 0 : i32
    %c0_i32_3 = arith.constant 0 : i32
    return %c0_i32_0, %1, %c0_i32_1, %c0_i32_2 : i32, i32, i32, i32
  }
  func.func @transform_1(%arg0: i32) -> (i32, i32, i32, i32) {
    %c1_i32 = arith.constant 1 : i32
    %0 = arith.muli %c1_i32, %arg0 : i32
    %c1_i32_0 = arith.constant 1 : i32
    %1 = arith.addi %0, %c1_i32_0 : i32
    %c0_i32 = arith.constant 0 : i32
    %c0_i32_1 = arith.constant 0 : i32
    %c0_i32_2 = arith.constant 0 : i32
    %c0_i32_3 = arith.constant 0 : i32
    return %c0_i32, %1, %c0_i32_1, %c0_i32_2 : i32, i32, i32, i32
  }
  func.func @transform_2(%arg0: i32) -> (i32, i32, i32, i32) {
    %c1_i32 = arith.constant 1 : i32
    %0 = arith.muli %c1_i32, %arg0 : i32
    %c2_i32 = arith.constant 2 : i32
    %1 = arith.addi %0, %c2_i32 : i32
    %c0_i32 = arith.constant 0 : i32
    %c0_i32_0 = arith.constant 0 : i32
    %c0_i32_1 = arith.constant 0 : i32
    %c0_i32_2 = arith.constant 0 : i32
    return %c0_i32, %1, %c0_i32_0, %c0_i32_1 : i32, i32, i32, i32
  }
  func.func @transform_3(%arg0: i32) -> (i32, i32, i32) {
    %c0_i32 = arith.constant 0 : i32
    %c0_i32_0 = arith.constant 0 : i32
    %c0_i32_1 = arith.constant 0 : i32
    %c0_i32_2 = arith.constant 0 : i32
    return %c0_i32, %c0_i32_0, %c0_i32_1 : i32, i32, i32
  }
  func.func @transform_4(%arg0: i32) -> (i32, i32, i32, i32) {
    %c0_i32 = arith.constant 0 : i32
    %c0_i32_0 = arith.constant 0 : i32
    %c0_i32_1 = arith.constant 0 : i32
    %c0_i32_2 = arith.constant 0 : i32
    return %c0_i32, %arg0, %c0_i32_0, %c0_i32_1 : i32, i32, i32, i32
  }
  func.func @transform_5(%arg0: i32) -> (i32, i32) {
    %c0_i32 = arith.constant 0 : i32
    %c0_i32_0 = arith.constant 0 : i32
    return %arg0, %c0_i32 : i32, i32
  }
}

</mosaic_0001>

<bundles_post_ra>
// kernel: resnet_block_forward.7
= control target key start
LH: loop header
LB: loop body
LE: loop exit
PB: predicated region body
PF: predicated region fallthrough
CT: control target
= control target key end

     0   :  { %s650_s21 = smov 0   ;;  %s652_s22 = smov 0   ;;  %s735_s0 = inlined_call_operand.vmem [shape: bf16[2,8,8,128], index: 0, kind: input, shape index: {}]   ;;  %s736_s1 = inlined_call_operand.vmem [shape: f32[1,128], index: 1, kind: input, shape index: {}]   ;;  %s737_s2 = inlined_call_operand.vmem [shape: f32[1,128], index: 2, kind: input, shape index: {}]   ;;  %s738_s3 = inlined_call_operand.vmem [shape: bf16[2,8,8,256], index: 3, kind: input, shape index: {}]   ;;  %s739_s4 = inlined_call_operand.vmem [shape: f32[1,128], index: 4, kind: input, shape index: {}]   ;;  %s740_s5 = inlined_call_operand.vmem [shape: f32[1,128], index: 5, kind: input, shape index: {}]   ;;  %s741_s6 = inlined_call_operand.vmem [shape: bf16[2,8,8,128], index: 6, kind: output, shape index: {}]  }
   0x1   :  { %s654_s23 = smov 0  }
   0x2 LB: > { %s530_s24 = sadd.s32 4294967295, %s613_s23   ;;  %s667_s25 = sadd.s32 1, %s613_s23   ;;  %s613_s23 = sphi %s654_s23, %s746_s23   ;;  %s609_s22 = sphi %s652_s22, %s745_s22   ;;  %s605_s21 = sphi %s650_s21, %s744_s21  }
   0x3   : > { %s20_s26 = ssub.s32 %s613_s23, %s667_s25  ;;  %s23_s27 = sadd.s32 1, %s609_s22 }
   0x4   : > { %p21_p0 = scmp.eq.s32.totalorder %s20_s26, 0  ;;  %p30_p1 = scmp.ne.s32.totalorder %s609_s22, %s605_s21 }
   0x5   : > { %p31_p2 = scmp.eq.s32.totalorder %s613_s23, 0  ;;  %p170_p3 = scmp.eq.s32.totalorder %s530_s24, 7 }
   0x6   : > { %s678_s28 = scalar_select %p21_p0, %s609_s22, %s23_s27  }
   0x7   : > { %p680_p4 = por %p31_p2, %p30_p1  ;;  %p684_p5 = por %p170_p3, %p30_p1 }
   0x8   : > { %p533_p6 = scmp.ge.s32.totalorder %s613_s23, 8 }
   0xa   : > { %204 = sbr.rel (%p533_p6) target bundleno = 27 (0x1b), region = 32 }
   0xf   : > { %207 = sbr.rel (!%p680_p4) target bundleno = 21 (0x15), region = 36  ;;  %s209_s7 = sand.u32 (%p680_p4), 1, %s609_s22  }
  0x10   : > { %s535_s8 = sshll.u32 (%p680_p4), %s613_s23, 2  ;;  %s534_s9 = sshll.u32 (%p680_p4), %s209_s7, 3 }
  0x11   : > { %s213_s12 = scalar_lea.vmem (%p680_p4), %s735_s0, %s535_s8  ;;  %s211_s13 = scalar_lea.vmem (%p680_p4), [#allocation2], %s534_s9 }
  0x12   : > { %v230_v0 = vld [vmem:[%s213_s12] sm:$0xf] (%p680_p4) }
  0x13   : > { %v232_v1 = vld [vmem:[%s213_s12 + $0x20] sm:$0xf] (%p680_p4)  ;;  %231 = vst [vmem:[%s211_s13] sm:$0xf] (%p680_p4), %v230_v0 }
  0x14   : > { %233 = vst [vmem:[%s211_s13 + $0x4] sm:$0xf] %v232_v1 }
  0x15 PF: > { %261 = sbr.rel (!%p680_p4) target bundleno = 27 (0x1b), region = 77  ;;  %s263_s14 = sand.u32 (%p680_p4), 1, %s609_s22  }
  0x16   : > { %s549_s15 = sshll.u32 (%p680_p4), %s613_s23, 3  ;;  %s536_s16 = sshll.u32 (%p680_p4), %s263_s14, 3 }
  0x17   : > { %s474_s19 = scalar_lea.vmem (%p680_p4), %s738_s3, %s549_s15  ;;  %s265_s20 = scalar_lea.vmem (%p680_p4), [#allocation3], %s536_s16 }
  0x18   : > { %v539_v2 = vld [vmem:[%s474_s19 + $0x4] sm:$0xf] (%p680_p4) }
  0x19   : > { %v540_v3 = vld [vmem:[%s474_s19 + $0x44] sm:$0xf] (%p680_p4)  ;;  %287 = vst [vmem:[%s265_s20] sm:$0xf] (%p680_p4), %v539_v2 }
  0x1a   : > { %289 = vst [vmem:[%s265_s20 + $0x4] sm:$0xf] %v540_v3 }
  0x1b PF: > { %p541_p7 = scmp.ge.s32.totalorder %s613_s23, 1  ;;  %p316_p8 = scmp.lt.s32.totalorder %s613_s23, 9 }
  0x1d   : > { %p317_p9 = pnand %p541_p7, %p316_p8 }
  0x1e   : > { %s323_s26 = sand.u32 (!%p317_p9), 1, %s605_s21  }
  0x1f   : > { %320 = sbr.rel (%p317_p9) target bundleno = 61 (0x3d), region = 118  ;;  %s542_s27 = sshll.u32 (!%p317_p9), %s323_s26, 3 }
  0x20   : > { %s325_s10 = scalar_lea.vmem (!%p317_p9), [#allocation2], %s542_s27  ;;  %s332_s11 = scalar_lea.vmem (!%p317_p9), [#allocation3], %s542_s27 }
  0x21   : > { %s361_s15 = scalar_lea.vmem (!%p317_p9), [#allocation4], %s542_s27 }
  0x24   : > { %v587_v4 = vld [vmem:[%s736_s1] ss:$0 sm:$0xff]  ;;  %v555_v7 = vld [vmem:[%s332_s11] sm:$0xff]   ;;  %s546_s16 = sshll.u32 (%p684_p5), %s530_s24, 2 }
  0x25   : > { %v589_v5 = vld [vmem:[%s739_s4] ss:$0 sm:$0xff]  ;;  %v556_v11 = vunpack.c.l.bf16 %v555_v7  ;;  %v557_v12 = vunpack.c.h.bf16 %v555_v7  ;;  %s408_s19 = scalar_lea.vmem (%p684_p5), %s741_s6, %s546_s16 }
  0x26   : > { %v551_v6 = vld [vmem:[%s325_s10] sm:$0xff]  }
  0x27   : > { %v552_v8 = vunpack.c.l.bf16 %v551_v6  ;;  %v553_v9 = vunpack.c.h.bf16 %v551_v6  ;;  %v588_v10 = vld [vmem:[%s737_s2] ss:$0 sm:$0xff]  ;;  %v386_v15 = vmul.f32 %v589_v5, %v556_v11  ;;  %v387_v16 = vmul.f32 %v589_v5, %v557_v12 }
  0x28   : > { %v590_v19 = vld [vmem:[%s740_s5] ss:$0 sm:$0xff] }
  0x29   : > { %v370_v13 = vmul.f32 %v587_v4, %v552_v8  ;;  %v371_v14 = vmul.f32 %v587_v4, %v553_v9 }
  0x2b   : > { %v376_v17 = vadd.f32 %v588_v10, %v370_v13  ;;  %v377_v18 = vadd.f32 %v588_v10, %v371_v14 }
  0x2d   : > { %v388_v20 = vadd.f32 %v386_v15, %v376_v17  ;;  %v389_v21 = vadd.f32 %v387_v16, %v377_v18 }
  0x2f   : > { %v394_v22 = vadd.f32 %v590_v19, %v388_v20  ;;  %v395_v23 = vadd.f32 %v590_v19, %v389_v21  ;;  %406 = sbr.rel (!%p684_p5) target bundleno = 61 (0x3d), region = 130 }
  0x31   : > { %v561_v24 = vpack.c.bf16 %v395_v23, %v394_v22 }
  0x33   : > { %562 = vst [vmem:[%s361_s15] sm:$0xff] %v561_v24  }
  0x3a   : > { %v425_v25 = vld [vmem:[%s361_s15] sm:$0xf]  ;;  %v427_v26 = vld [vmem:[%s361_s15 + $0x4] sm:$0xf] }
  0x3b   : > { %426 = vst [vmem:[%s408_s19] sm:$0xf] %v425_v25 }
  0x3c   : > { %428 = vst [vmem:[%s408_s19 + $0x20] sm:$0xf] %v427_v26 }
  0x3d PF: > { %p13_p10 = scmp.ge.s32.totalorder %s667_s25, 10   ;;  %s744_s21 = smov %s609_s22 }
  0x3e   : > { %s745_s22 = smov %s678_s28  ;;  %s746_s23 = smov %s667_s25 }
  0x3f   :  { %15 = sbr.rel (!%p13_p10) target bundleno = 2 (0x2), region = 210 }

// kernel: resnet_block_forward.5
= control target key start
LH: loop header
LB: loop body
LE: loop exit
PB: predicated region body
PF: predicated region fallthrough
CT: control target
= control target key end

     0   :  { %s546_s12 = smov 0   ;;  %s548_s13 = smov 0   ;;  %s640_s0 = inlined_call_operand.vmem [shape: bf16[2,8,8,256], index: 0, kind: input, shape index: {}]   ;;  %s641_s1 = inlined_call_operand.vmem [shape: f32[1,128], index: 1, kind: input, shape index: {}]   ;;  %s642_s2 = inlined_call_operand.vmem [shape: f32[1,128], index: 2, kind: input, shape index: {}]   ;;  %s643_s3 = inlined_call_operand.vmem [shape: bf16[2,10,10,128], index: 3, kind: output, shape index: {}]  }
   0x1   :  { %s550_s14 = smov 0   ;;  %s552_s15 = smov 0  }
   0x2   :  { %s554_s16 = smov 0  }
   0x3 LB: > { %s572_s17 = sadd.s32 4294967295, %s524_s16   ;;  %s575_s18 = sadd.s32 1, %s524_s16   ;;  %s524_s16 = sphi %s554_s16, %s649_s16   ;;  %s520_s15 = sphi %s552_s15, %s648_s15   ;;  %s516_s14 = sphi %s550_s14, %s647_s14   ;;  %s512_s13 = sphi %s548_s13, %s646_s13   ;;  %s508_s12 = sphi %s546_s12, %s645_s12  }
   0x4   : > { %p18_p0 = scmp.gt.s32.totalorder %s572_s17, 0  ;;  %p401_p1 = scmp.lt.s32.totalorder %s572_s17, 7 }
   0x5   : > { %s406_s19 = sadd.s32 4294967295, %s575_s18  ;;  %s30_s20 = sadd.s32 1, %s520_s15 }
   0x6   : > { %s19_s21 = scalar_select %p18_p0, %s572_s17, 0 }
   0x7   : > { %p23_p2 = scmp.gt.s32.totalorder %s406_s19, 0  ;;  %p407_p3 = scmp.lt.s32.totalorder %s406_s19, 7 }
   0x8   : > { %s651_s21 = smov (!%p401_p1, %s19_s21), 7  ;;  %p37_p4 = scmp.ne.s32.totalorder %s520_s15, %s516_s14 }
   0x9   : > { %s653_s19 = smov (!%p23_p2, %s406_s19), 0  ;;  %p38_p5 = scmp.eq.s32.totalorder %s524_s16, 0 }
   0xa   : > { %s655_s19 = smov (!%p407_p3, %s653_s19), 7  ;;  %s95_s22 = ssub.s32 %s524_s16, %s575_s18 }
   0xb   : > { %p39_p6 = por %p38_p5, %p37_p4  ;;  %s27_s23 = ssub.s32 %s651_s21, %s655_s19 }
   0xc   : > { %p96_p7 = scmp.eq.s32.totalorder %s95_s22, 0  ;;  %p28_p8 = scmp.eq.s32.totalorder %s27_s23, 0 }
   0xd   : > { %s98_s24 = sadd.s32 1, %s512_s13  ;;  %p108_p9 = scmp.ne.s32.totalorder %s512_s13, %s508_s12 }
   0xe   : > { %s589_s25 = scalar_select %p96_p7, %s512_s13, %s98_s24  }
   0xf   : > { %s592_s26 = scalar_select %p28_p8, %s520_s15, %s30_s20  }
  0x10   : > { %p109_p10 = scmp.eq.s32.totalorder %s572_s17, 9  ;;  %p413_p12 = scmp.ge.s32.totalorder %s524_s16, 10 }
  0x12   : > { %p597_p11 = por %p109_p10, %p108_p9  ;;  %137 = sbr.rel (%p413_p12) target bundleno = 29 (0x1d), region = 24 }
  0x17   : > { %140 = sbr.rel (!%p39_p6) target bundleno = 29 (0x1d), region = 28  ;;  %s142_s28 = sand.u32 (%p39_p6), 1, %s520_s15  }
  0x18   : > { %s438_s29 = sshll.u32 (%p39_p6), %s651_s21, 3  ;;  %s414_s30 = sshll.u32 (%p39_p6), %s142_s28, 3 }
  0x19   : > { %s152_s6 = scalar_lea.vmem (%p39_p6), %s640_s0, %s438_s29  ;;  %s144_s7 = scalar_lea.vmem (%p39_p6), [#allocation2], %s414_s30 }
  0x1a   : > { %v169_v0 = vld [vmem:[%s152_s6] sm:$0xf] (%p39_p6) }
  0x1b   : > { %v171_v1 = vld [vmem:[%s152_s6 + $0x40] sm:$0xf] (%p39_p6)  ;;  %170 = vst [vmem:[%s144_s7] sm:$0xf] (%p39_p6), %v169_v0 }
  0x1c   : > { %172 = vst [vmem:[%s144_s7 + $0x4] sm:$0xf] %v171_v1 }
  0x1d PF: > { %p423_p13 = scmp.ge.s32.totalorder %s524_s16, 1  ;;  %p199_p0 = scmp.lt.s32.totalorder %s524_s16, 11 }
  0x1f   : > { %p200_p1 = pnand %p423_p13, %p199_p0 }
  0x20   : > { %s206_s8 = sand.u32 (!%p200_p1), 1, %s516_s14   ;;  %p233_p2 = scmp.ge.s32.totalorder (!%p200_p1), %s572_s17, 1 }
  0x21   : > { %203 = sbr.rel (%p200_p1) target bundleno = 66 (0x42), region = 69  ;;  %s424_s9 = sshll.u32 (!%p200_p1), %s206_s8, 3 }
  0x22   : > { %p234_p3 = scmp.le.s32.totalorder (!%p200_p1), %s572_s17, 8  ;;  %s208_s19 = scalar_lea.vmem (!%p200_p1), [#allocation2], %s424_s9 }
  0x23   : > { %s225_s16 = sand.u32 (!%p200_p1), 1, %s508_s12  }
  0x24   : > { %p235_p4 = pnand (!%p200_p1), %p234_p3, %p233_p2  ;;  %s425_s22 = sshll.u32 (!%p200_p1), %s225_s16, 4 }
  0x25   : > { %s227_s23 = scalar_lea.vmem (!%p200_p1), [#allocation3], %s425_s22 }
  0x26   : > { %v484_v2 = vld [vmem:[%s641_s1] ss:$0 sm:$0xff]  ;;  %s426_s14 = scalar_select %p235_p4, 0, 1  ;;  %vm266_vm1 = vcmask 1040384  }
  0x27   : > { %v441_v3 = vld [vmem:[%s208_s19] sm:$0xff]   ;;  %s439_s12 = sshll.u32 (%p597_p11), %s572_s17, 3 }
  0x28   : > { %v442_v4 = vunpack.c.l.bf16 %v441_v3  ;;  %v485_v5 = vld [vmem:[%s642_s2] ss:$0 sm:$0xff]  ;;  %v443_v6 = vunpack.c.h.bf16 %v441_v3  ;;  %v256_v11 = vstv %s426_s14  ;;  %s288_s29 = scalar_lea.vmem (%p597_p11), %s643_s3, %s439_s12 }
  0x29   : > { %vm257_vm0 = vcmp.eq.s32.totalorder %v256_v11, 1 }
  0x2a   : > { %v245_v7 = vmul.f32 %v484_v2, %v442_v4  ;;  %v246_v8 = vmul.f32 %v484_v2, %v443_v6 }
  0x2c   : > { %v251_v9 = vadd.f32 %v485_v5, %v245_v7  ;;  %v252_v10 = vadd.f32 %v485_v5, %v246_v8 }
  0x2e   : > { %v253_v12 = vmax.f32 %v251_v9, 0.0  ;;  %v254_v13 = vmax.f32 %v252_v10, 0.0 }
  0x30   : > { %v258_v14 = vsel %vm257_vm0, %v253_v12, 0.0  ;;  %v259_v15 = vsel %vm257_vm0, %v254_v13, 0.0 }
  0x31   : > { %v262_v16 = vrot.slane %v258_v14, 7  ;;  %v263_v17 = vrot.slane %v259_v15, 7 }
  0x33   : > { %v267_v18 = vsel %vm266_vm1, 0.0, %v262_v16  ;;  %v269_v19 = vsel %vm266_vm1, %v262_v16, 0.0  ;;  %v268_v20 = vsel %vm266_vm1, 0.0, %v263_v17  ;;  %v270_v21 = vsel %vm266_vm1, %v263_v17, 0.0 }
  0x34   : > { %v271_v22 = vpack.c.bf16 %v267_v18, %v267_v18  ;;  %v272_v23 = vpack.c.bf16 %v269_v19, %v269_v19  ;;  %v273_v24 = vpack.c.bf16 %v268_v20, %v268_v20  ;;  %v274_v25 = vpack.c.bf16 %v270_v21, %v270_v21 }
  0x35   : > { %285 = sbr.rel (!%p597_p11) target bundleno = 66 (0x42), region = 77 }
  0x36   : > { %275 = vst [vmem:[%s227_s23] sm:$0xf] %v271_v22 }
  0x37   : > { %276 = vst [vmem:[%s227_s23 + $0x4] sm:$0x1] %v272_v23 }
  0x38   : > { %277 = vst [vmem:[%s227_s23 + $0x8] sm:$0xf] %v273_v24 }
  0x39   : > { %278 = vst [vmem:[%s227_s23 + $0xc] sm:$0x1] %v274_v25 }
  0x3e   : > { %v305_v26 = vld [vmem:[%s227_s23] sm:$0xff]  }
  0x3f   : > { %306 = vst [vmem:[%s288_s29] sm:$0xff] %v305_v26  }
  0x40   : > { %v309_v27 = vld [vmem:[%s227_s23 + $0x8] sm:$0xff]  }
  0x41   : > { %310 = vst [vmem:[%s288_s29 + $0x50] sm:$0xff] %v309_v27  }
  0x42 PF: > { %p10_p5 = scmp.ge.s32.totalorder %s575_s18, 12   ;;  %s645_s12 = smov %s512_s13 }
  0x43   : > { %s646_s13 = smov %s589_s25  ;;  %s647_s14 = smov %s520_s15 }
  0x44   : > { %s648_s15 = smov %s592_s26  ;;  %s649_s16 = smov %s575_s18 }
  0x45   :  { %12 = sbr.rel (!%p10_p5) target bundleno = 3 (0x3), region = 149 }

// kernel: resnet_block_forward.6
= control target key start
LH: loop header
LB: loop body
LE: loop exit
PB: predicated region body
PF: predicated region fallthrough
CT: control target
= control target key end

     0   :  { %s1244_s18 = smov 0   ;;  %s1246_s19 = smov 0   ;;  %s1529_s0 = inlined_call_operand.vmem [shape: bf16[2,10,10,128], index: 0, kind: input, shape index: {}, may-alias: {0,1,2}]   ;;  %s1530_s1 = inlined_call_operand.vmem [shape: bf16[2,10,10,128], index: 1, kind: input, shape index: {}, may-alias: {0,1,2}]   ;;  %s1531_s2 = inlined_call_operand.vmem [shape: bf16[2,10,10,128], index: 2, kind: input, shape index: {}, may-alias: {0,1,2}]   ;;  %s1532_s3 = inlined_call_operand.vmem [shape: bf16[9,8,128], index: 3, kind: input, shape index: {}]   ;;  %s1533_s4 = inlined_call_operand.vmem [shape: bf16[2,8,8,128], index: 4, kind: output, shape index: {0}]   ;;  %s1534_s5 = inlined_call_operand.vmem [shape: f32[64,128], index: 5, kind: output, shape index: {1}]  }
   0x1   :  { %s1248_s20 = smov 0   ;;  %s1250_s21 = smov 0  }
   0x2   :  { %s1252_s22 = smov 0   ;;  %s1254_s23 = smov 0  }
   0x3   :  { %s1256_s24 = smov 0  }
   0x4 LB: > { %1536 = sst [smem:[#allocation6_spill]] %s1208_s23  ;;  %s1280_s25 = sadd.s32 4294967295, %s1212_s24   ;;  %s1212_s24 = sphi %s1256_s24, %s1552_s24   ;;  %s1208_s23 = sphi %s1254_s23, %s1547_s23   ;;  %s1204_s22 = sphi %s1252_s22, %s1546_s22   ;;  %s1200_s21 = sphi %s1250_s21, %s1551_s21   ;;  %s1196_s20 = sphi %s1248_s20, %s1550_s20   ;;  %s1192_s19 = sphi %s1246_s19, %s1549_s19   ;;  %s1188_s18 = sphi %s1244_s18, %s1548_s18  }
   0x5   : > { %s1283_s26 = sadd.s32 1, %s1212_s24   ;;  %s23_s28 = sadd.s32 1, %s1208_s23 }
   0x6   : > { %s20_s27 = ssub.s32 %s1212_s24, %s1283_s26  ;;  %p30_p1 = scmp.ne.s32.totalorder %s1208_s23, %s1204_s22 }
   0x7   : > { %p21_p0 = scmp.eq.s32.totalorder %s20_s27, 0  ;;  %p31_p2 = scmp.eq.s32.totalorder %s1212_s24, 0 }
   0x8   : > { %s47_s29 = sadd.s32 1, %s1283_s26  ;;  %s51_s8 = sadd.s32 1, %s1200_s21 }
   0x9   : > { %s1293_s30 = scalar_select %p21_p0, %s1208_s23, %s23_s28  }
   0xa   : > { %p1300_p3 = por %p31_p2, %p30_p1  ;;  %s48_s7 = ssub.s32 %s1283_s26, %s47_s29 }
   0xb   : > { %1537 = sst [smem:[#allocation7_spill]] %s1293_s30  ;;  %p49_p4 = scmp.eq.s32.totalorder %s48_s7, 0 }
   0xc   : > { %p58_p5 = scmp.ne.s32.totalorder %s1200_s21, %s1196_s20  ;;  %s74_s9 = sadd.s32 2, %s1212_s24 }
   0xd   : > { %s1310_s10 = scalar_select %p49_p4, %s1200_s21, %s51_s8  }
   0xe   : > { %p1314_p6 = por %p58_p5, %p31_p2  ;;  %s75_s12 = sadd.s32 2, %s1283_s26 }
   0xf   : > { %s76_s13 = ssub.s32 %s74_s9, %s75_s12  ;;  %s79_s14 = sadd.s32 1, %s1192_s19 }
  0x10   : > { %p77_p7 = scmp.eq.s32.totalorder %s76_s13, 0  ;;  %p86_p8 = scmp.ne.s32.totalorder %s1192_s19, %s1188_s18 }
  0x11   : > { %p137_p9 = scmp.eq.s32.totalorder %s1280_s25, 7  ;;  %p1032_p12 = scmp.ge.s32.totalorder %s1212_s24, 8 }
  0x12   : > { %s1324_s15 = scalar_select %p77_p7, %s1192_s19, %s79_s14  }
  0x13   : > { %p1328_p10 = por %p86_p8, %p31_p2  ;;  %p1335_p11 = por %p137_p9, %p30_p1 }
  0x14   : > { %188 = sbr.rel (%p1032_p12) target bundleno = 43 (0x2b), region = 20 }
  0x19   : > { %191 = sbr.rel (!%p1300_p3) target bundleno = 31 (0x1f), region = 24  ;;  %s193_s27 = sand.u32 (%p1300_p3), 1, %s1208_s23  }
  0x1a   : > { %s1093_s28 = sshll.u32 (%p1300_p3), %s1212_s24, 3  ;;  %s1033_s29 = sshll.u32 (%p1300_p3), %s193_s27, 4 }
  0x1b   : > { %s198_s9 = scalar_lea.vmem (%p1300_p3), %s1529_s0, %s1093_s28  ;;  %s195_s12 = scalar_lea.vmem (%p1300_p3), [#allocation2], %s1033_s29 }
  0x1c   : > { %v215_v0 = vld [vmem:[%s198_s9] sm:$0xff] (%p1300_p3)   ;;  %v219_v1 = vld [vmem:[%s198_s9 + $0x50] sm:$0xff] (%p1300_p3)  }
  0x1d   : > { %216 = vst [vmem:[%s195_s12] sm:$0xff] (%p1300_p3), %v215_v0  }
  0x1e   : > { %220 = vst [vmem:[%s195_s12 + $0x8] sm:$0xff] %v219_v1  }
  0x1f PF: > { %254 = sbr.rel (!%p1314_p6) target bundleno = 37 (0x25), region = 65  ;;  %s256_s6 = sand.u32 (%p1314_p6), 1, %s1200_s21  }
  0x20   : > { %s1037_s13 = sshll.u32 (%p1314_p6), %s1212_s24, 3  ;;  %s1036_s14 = sshll.u32 (%p1314_p6), %s256_s6, 4 }
  0x21   : > { %s937_s23 = scalar_lea.vmem (%p1314_p6), %s1530_s1, %s1037_s13  ;;  %s258_s28 = scalar_lea.vmem (%p1314_p6), [#allocation3], %s1036_s14 }
  0x22   : > { %v1038_v2 = vld [vmem:[%s937_s23 + $0x8] sm:$0xff] (%p1314_p6)   ;;  %v1040_v3 = vld [vmem:[%s937_s23 + $0x58] sm:$0xff] (%p1314_p6)  }
  0x23   : > { %280 = vst [vmem:[%s258_s28] sm:$0xff] (%p1314_p6), %v1038_v2  }
  0x24   : > { %284 = vst [vmem:[%s258_s28 + $0x8] sm:$0xff] %v1040_v3  }
  0x25 PF: > { %318 = sbr.rel (!%p1328_p10) target bundleno = 43 (0x2b), region = 106  ;;  %s320_s11 = sand.u32 (%p1328_p10), 1, %s1192_s19  }
  0x26   : > { %s1043_s29 = sshll.u32 (%p1328_p10), %s1212_s24, 3  ;;  %s1042_s7 = sshll.u32 (%p1328_p10), %s320_s11, 4 }
  0x27   : > { %s942_s12 = scalar_lea.vmem (%p1328_p10), %s1531_s2, %s1043_s29  ;;  %s322_s30 = scalar_lea.vmem (%p1328_p10), [#allocation4], %s1042_s7 }
  0x28   : > { %v1044_v4 = vld [vmem:[%s942_s12 + $0x10] sm:$0xff] (%p1328_p10)   ;;  %v1046_v5 = vld [vmem:[%s942_s12 + $0x60] sm:$0xff] (%p1328_p10)  }
  0x29   : > { %344 = vst [vmem:[%s322_s30] sm:$0xff] (%p1328_p10), %v1044_v4  }
  0x2a   : > { %348 = vst [vmem:[%s322_s30 + $0x8] sm:$0xff] %v1046_v5  }
  0x2b PF: > { %p1048_p13 = scmp.ge.s32.totalorder %s1212_s24, 1  ;;  %p381_p0 = scmp.lt.s32.totalorder %s1212_s24, 9 }
  0x2d   : > { %p382_p1 = pnand %p1048_p13, %p381_p0 }
  0x2e   : > { %s388_s14 = sand.u32 (!%p382_p1), 1, %s1204_s22   ;;  %s395_s27 = sand.u32 (!%p382_p1), 1, %s1196_s20  }
  0x2f   : > { %385 = sbr.rel (%p382_p1) target bundleno = 260 (0x104), region = 147  ;;  %s1049_s24 = sshll.u32 (!%p382_p1), %s388_s14, 4 }
  0x30   : > { %s1381_s8 = scalar_lea.vmem (!%p382_p1), [#allocation2], %s1049_s24  ;;  %s1050_s20 = sshll.u32 (!%p382_p1), %s395_s27, 4 }
  0x31   : > { %s402_s9 = sand.u32 (!%p382_p1), 1, %s1188_s18   ;;  %s1398_s12 = scalar_lea.vmem (!%p382_p1), [#allocation3], %s1050_s20 }
  0x32   : > { %s1407_s23 = sshll.u32 (!%p382_p1), %s402_s9, 4  ;;  %p442_p2 = scmp.lt.s32.totalorder (!%p382_p1), %s1280_s25, 7 }
  0x33   : > { %s404_s11 = scalar_lea.vmem (!%p382_p1), [#allocation4], %s1407_s23 }
  0x34   : > { %vm500_vm0 = vcmask 1043456   ;;  %v1063_v6 = vld [vmem:[%s1532_s3 + $0x8] sm:$0xf]  ;;  %v1065_v7 = vld [vmem:[%s1532_s3 + $0xc] sm:$0xf]  ;;  %vm545_vm1 = vcmask 1042432  }
  0x35   : > { %v565_v8 = vsel %vm500_vm0, %v1063_v6, 0  ;;  %v594_v9 = vsel %vm500_vm0, %v1065_v7, 0  ;;  %vm546_vm2 = vcmask 1046532   ;;  %v1054_v10 = vld [vmem:[%s1532_s3 + $0x4] sm:$0xf]  ;;  %vm496_vm6 = vcmask 64512  }
  0x36   : > { %574 = vmatpush.bf16.msra.mxu2 %v565_v8  ;;  %603 = vmatpush.bf16.msra.mxu3 %v594_v9  ;;  %v459_v11 = vld [vmem:[%s1532_s3] sm:$0xf]  ;;  %v448_v13 = vld [vmem:[%s1381_s8 + $0x4] sm:$0x1]  ;;  %v449_v14 = vld [vmem:[%s1381_s8 + $0x8] sm:$0xf] }
  0x37   : > { %v447_v12 = vld [vmem:[%s1381_s8] sm:$0xf]  ;;  %v450_v15 = vld [vmem:[%s1381_s8 + $0xc] sm:$0x1]  ;;  %vm1387_vm3 = vmor %vm545_vm1, %vm546_vm2  ;;  %v550_v18 = vrot.slane %v448_v13, 5  ;;  %v1062_v19 = vrot.slane %v449_v14, 9 }
  0x38   : > { %v1061_v17 = vrot.slane %v447_v12, 9  ;;  %v502_v20 = vsel %vm500_vm0, %v1054_v10, 0  ;;  %v554_v21 = vrot.slane %v450_v15, 5  ;;  %v527_v22 = vsel %vm500_vm0, %v459_v11, 0  ;;  %v1068_v29 = vld [vmem:[%s1398_s12] sm:$0xf] }
  0x39   : > { %511 = vmatpush.bf16.msra.mxu0 %v502_v20  ;;  %vm460_vm4 = vsmask.f32 3328  ;;  %v464_v23 = vshrl.u32 %v447_v12, 16  ;;  %536 = vmatpush.bf16.msra.mxu1 %v527_v22  ;;  %vm461_vm5 = vsmask.f32 7440  ;;  %v467_v25 = vshll.u32 %v447_v12, 16 }
  0x3a   : > { %v551_v24 = vsel %vm1387_vm3, %v1061_v17, %v550_v18  ;;  %v473_v26 = vshll.u32 %v448_v13, 16  ;;  %v555_v27 = vsel %vm1387_vm3, %v1062_v19, %v554_v21  ;;  %v1095_v30 = vld [vmem:[%s1398_s12 + $0x4] sm:$0xf0]  ;;  %v478_v32 = vshrl.u32 %v449_v14, 16  ;;  %v1058_v36 = vld [vmem:[%s1381_s8] sm:$0xf]  ;;  %vm1419_vm7 = vmor %vm460_vm4, %vm461_vm5 }
  0x3b   : > { %v558_v28 = vunpack.c.l.b16 %v551_v24  ;;  %v466_v31 = vrot.slane %v464_v23, 4  ;;  %v559_v33 = vunpack.c.l.b16 %v555_v27  ;;  %v1069_v34 = vor.u32 %v1095_v30, %v1068_v29  ;;  %v1094_v37 = vld [vmem:[%s1381_s8 + $0x4] sm:$0xf0]  ;;  %v1071_v42 = vld [vmem:[%s1532_s3 + $0x10] sm:$0xf]  ;;  %s1052_s8 = sshll.u32 %s388_s14, 3 }
  0x3c   : > { %v469_v35 = vrot.slane %v467_v25, 5  ;;  %v480_v38 = vrot.slane %v478_v32, 4  ;;  %v481_v39 = vshll.u32 %v449_v14, 16  ;;  %v487_v40 = vshll.u32 %v450_v15, 16  ;;  %v1077_v47 = vld [vmem:[%s1532_s3 + $0x18] sm:$0xf] }
  0x3d   : > { %v1059_v41 = vor.u32 %v1094_v37, %v1058_v36  ;;  %v560_v43 = vpack.c.b16 %v559_v33, %v558_v28  ;;  %1070 = vmatmul.msk.bf16.vlgmr.msra.gmra.mxu3 %vm496_vm6, %v1069_v34  ;;  %v475_v45 = vrot.slane %v473_v26, 5  ;;  %v649_v46 = vsel %vm500_vm0, %v1071_v42, 0  ;;  %v1083_v48 = vld [vmem:[%s1532_s3 + $0x1c] sm:$0xf]  ;;  %v1075_v53 = vld [vmem:[%s1532_s3 + $0x14] sm:$0xf] }
  0x3e   : > { %v470_v44 = vor.u32 %v469_v35, %v466_v31  ;;  %v483_v50 = vrot.slane %v481_v39, 5  ;;  %658 = vmatpush.bf16.msrb.mxu0 %v649_v46  ;;  %v715_v51 = vsel %vm500_vm0, %v1077_v47, 0  ;;  %v770_v52 = vsel %vm500_vm0, %v1083_v48, 0  ;;  %v1432_v58 = vld [vmem:[%s1398_s12] sm:$0xf]  ;;  %s433_s20 = scalar_lea.vmem [#allocation5], %s1052_s8 }
  0x3f   : > { %1060 = vmatmul.msk.bf16.vlgmr.msra.gmra.mxu1 %vm496_vm6, %v1059_v41  ;;  %1064 = vmatmul.msk.bf16.vlgmr.msra.gmra.mxu2 %vm496_vm6, %v560_v43  ;;  %v686_v55 = vsel %vm500_vm0, %v1075_v53, 0  ;;  %v489_v57 = vrot.slane %v487_v40, 5  ;;  %v1435_v59 = vld [vmem:[%s1398_s12 + $0x8] sm:$0xf]  ;;  %v452_v61 = vld [vmem:[%s1398_s12 + $0x4] sm:$0x1] }
  0x40   : > { %v471_v54 = vrot.slane %v470_v44, 4  ;;  %779 = vmatpush.bf16.msrb.mxu3 %v770_v52  ;;  %v484_v56 = vor.u32 %v483_v50, %v480_v38  ;;  %724 = vmatpush.bf16.msrb.mxu2 %v715_v51  ;;  %v1441_v62 = vld [vmem:[%s1398_s12 + $0xc] sm:$0x1]  ;;  %v613_v63 = vshrl.u32 %v1432_v58, 16  ;;  %v616_v0 = vshll.u32 %v1432_v58, 16  ;;  %s443_s9 = scalar_select %p442_p2, %s1280_s25, 7 }
  0x41   : > { %695 = vmatpush.bf16.msrb.mxu1 %v686_v55  ;;  %v627_v2 = vshrl.u32 %v1435_v59, 16  ;;  %v630_v3 = vshll.u32 %v1435_v59, 16  ;;  %v1448_v4 = vld [vmem:[%s404_s11] sm:$0xf]  ;;  %v1450_v8 = vld [vmem:[%s404_s11 + $0x4] sm:$0x1] }
  0x42   : > { %v476_v60 = vsel %vm1419_vm7, %v471_v54, %v475_v45  ;;  %v485_v1 = vrot.slane %v484_v56, 4  ;;  %v615_v6 = vrot.slane %v613_v63, 4  ;;  %v618_v7 = vrot.slane %v616_v0, 5  ;;  %v1454_v13 = vld [vmem:[%s404_s11 + $0x8] sm:$0xf]  ;;  %s1053_s22 = sshll.u32 %s443_s9, 3 }
  0x43   : > { %v493_v5 = vunpack.c.l.b16 %v476_v60  ;;  %v622_v10 = vshll.u32 %v452_v61, 16  ;;  %v629_v11 = vrot.slane %v627_v2, 4  ;;  %v632_v12 = vrot.slane %v630_v3, 5  ;;  %v458_v20 = vld [vmem:[%s404_s11 + $0xc] sm:$0x1]  ;;  %s445_s18 = scalar_lea.vmem %s1534_s5, %s1053_s22  ;;  %s1090_s30 = sshll.u32 (%p1335_p11), %s1280_s25, 2 }
  0x44   : > { %v490_v9 = vsel %vm1419_vm7, %v485_v1, %v489_v57  ;;  %v619_v15 = vor.u32 %v618_v7, %v615_v6  ;;  %v636_v17 = vshll.u32 %v1441_v62, 16  ;;  %v734_v18 = vshrl.u32 %v1448_v4, 16  ;;  %v1080_v25 = vld [vmem:[%s404_s11] sm:$0xf]  ;;  %v1096_v28 = vld [vmem:[%s404_s11 + $0x4] sm:$0xf0]  ;;  %s862_s6 = scalar_lea.vmem (%p1335_p11), %s1533_s4, %s1090_s30 }
  0x45   : > { %v494_v14 = vunpack.c.l.b16 %v490_v9  ;;  %v633_v19 = vor.u32 %v632_v12, %v629_v11  ;;  %v737_v21 = vshll.u32 %v1448_v4, 16  ;;  %v743_v22 = vshll.u32 %v1450_v8, 16  ;;  %v1087_v31 = vld [vmem:[%s1532_s3 + $0x20] sm:$0xf] }
  0x46   : > { %v748_v23 = vshrl.u32 %v1454_v13, 16  ;;  %v736_v26 = vrot.slane %v734_v18, 4  ;;  %v751_v27 = vshll.u32 %v1454_v13, 16  ;;  %v624_v32 = vrot.slane %v622_v10, 5 }
  0x47   : > { %v495_v24 = vpack.c.b16 %v494_v14, %v493_v5  ;;  %v739_v29 = vrot.slane %v737_v21, 5  ;;  %v638_v33 = vrot.slane %v636_v17, 5  ;;  %v757_v35 = vshll.u32 %v458_v20, 16 }
  0x48   : > { %v750_v30 = vrot.slane %v748_v23, 4  ;;  %v753_v34 = vrot.slane %v751_v27, 5  ;;  %v620_v36 = vrot.slane %v619_v15, 4  ;;  %v634_v37 = vrot.slane %v633_v19, 4 }
  0x49   : > { %1055 = vmatmul.msk.bf16.vlgmr.msra.gmra.mxu0 %vm496_vm6, %v495_v24  ;;  %v740_v38 = vor.u32 %v739_v29, %v736_v26  ;;  %v745_v39 = vrot.slane %v743_v22, 5  ;;  %v1081_v40 = vor.u32 %v1096_v28, %v1080_v25  ;;  %v759_v42 = vrot.slane %v757_v35, 5 }
  0x4a   : > { %v754_v41 = vor.u32 %v753_v34, %v750_v30  ;;  %v807_v43 = vsel %vm500_vm0, %v1087_v31, 0  ;;  %v1073_v45 = vrot.slane %v1432_v58, 9  ;;  %v671_v46 = vrot.slane %v452_v61, 5 }
  0x4b   : > { %v741_v44 = vrot.slane %v740_v38, 4  ;;  %816 = vmatpush.bf16.msra.mxu0 %v807_v43  ;;  %v1074_v47 = vrot.slane %v1435_v59, 9  ;;  %v675_v50 = vrot.slane %v1441_v62, 5  ;;  %v625_v51 = vsel %vm1419_vm7, %v620_v36, %v624_v32 }
  0x4c   : > { %v755_v48 = vrot.slane %v754_v41, 4  ;;  %v639_v52 = vsel %vm1419_vm7, %v634_v37, %v638_v33  ;;  %v672_v54 = vsel %vm1387_vm3, %v1073_v45, %v671_v46  ;;  %v642_v61 = vunpack.c.l.b16 %v625_v51 }
  0x4d   : > { %v746_v53 = vsel %vm1419_vm7, %v741_v44, %v745_v39  ;;  %v676_v57 = vsel %vm1387_vm3, %v1074_v47, %v675_v50  ;;  %v679_v58 = vunpack.c.l.b16 %v672_v54  ;;  %v643_v62 = vunpack.c.l.b16 %v639_v52 }
  0x4e   : > { %v760_v55 = vsel %vm1419_vm7, %v755_v48, %v759_v42  ;;  %v763_v56 = vunpack.c.l.b16 %v746_v53  ;;  %v680_v60 = vunpack.c.l.b16 %v676_v57  ;;  %v792_v49 = vrot.slane %v1450_v8, 5 }
  0x4f   : > { %1082 = vmatmul.msk.bf16.vlgmr.msrb.gmra.mxu2 %vm496_vm6, %v1081_v40  ;;  %v764_v59 = vunpack.c.l.b16 %v760_v55  ;;  %v644_v1 = vpack.c.b16 %v643_v62, %v642_v61  ;;  %v796_v2 = vrot.slane %v458_v20, 5  ;;  %v1085_v3 = vrot.slane %v1448_v4, 9 }
  0x50   : > { %v681_v0 = vpack.c.b16 %v680_v60, %v679_v58  ;;  %v1086_v5 = vrot.slane %v1454_v13, 9  ;;  %vm845_vm8 = vcmask 1040384   ;;  %vm847_vm9 = vcmask 1041408  }
  0x51   : > { %v765_v63 = vpack.c.b16 %v764_v59, %v763_v56  ;;  %v793_v6 = vsel %vm1387_vm3, %v1085_v3, %v792_v49 }
  0x52   : > { %1076 = vmatmul.msk.bf16.vlgmr.msrb.gmra.mxu1 %vm496_vm6, %v681_v0  ;;  %v797_v7 = vsel %vm1387_vm3, %v1086_v5, %v796_v2  ;;  %v800_v9 = vunpack.c.l.b16 %v793_v6 }
  0x53   : > { %1084 = vmatmul.msk.bf16.vlgmr.msrb.gmra.mxu3 %vm496_vm6, %v765_v63  ;;  %v801_v10 = vunpack.c.l.b16 %v797_v7 }
  0x55   : > { %v802_v11 = vpack.c.b16 %v801_v10, %v800_v9 }
  0x59   : > { %1072 = vmatmul.msk.bf16.vlgmr.msrb.gmra.mxu0 %vm496_vm6, %v644_v1 }
  0x69   : > { %1088 = vmatmul.msk.bf16.vlgmr.msra.gmra.mxu0 %vm496_vm6, %v802_v11 }
  0xbc   : > { %v538_v14 = vpop.f32.mrf.mxu1 }
  0xc0   : > { %v605_v8 = vpop.f32.mrf.mxu3 }
  0xc2   : > { %v576_v15 = vpop.f32.mrf.mxu2 }
  0xc4   : > { %v540_v18 = vpop.f32.mrf.mxu1 }
  0xc6   : > { %v513_v12 = vpop.f32.mrf.mxu0 }
  0xc7   : > { %v539_v19 = vadd.f32 %v538_v14, %v513_v12 }
  0xc8   : > { %v607_v21 = vpop.f32.mrf.mxu3 }
  0xc9   : > { %v581_v23 = vadd.f32 %v576_v15, %v539_v19 }
  0xca   : > { %v578_v4 = vpop.f32.mrf.mxu2 }
  0xcb   : > { %v610_v25 = vadd.f32 %v605_v8, %v581_v23 }
  0xce   : > { %v515_v17 = vpop.f32.mrf.mxu0 }
  0xcf   : > { %v541_v20 = vadd.f32 %v540_v18, %v515_v17  ;;  %v697_v22 = vpop.f32.mrf.mxu1 }
  0xd1   : > { %v582_v16 = vadd.f32 %v578_v4, %v541_v20 }
  0xd2   : > { %v726_v24 = vpop.f32.mrf.mxu2 }
  0xd3   : > { %v611_v27 = vadd.f32 %v607_v21, %v582_v16 }
  0xd6   : > { %v660_v13 = vpop.f32.mrf.mxu0  ;;  %v781_v29 = vpop.f32.mrf.mxu3 }
  0xd7   : > { %v665_v28 = vadd.f32 %v660_v13, %v610_v25  ;;  %v699_v31 = vpop.f32.mrf.mxu1 }
  0xd9   : > { %v702_v32 = vadd.f32 %v697_v22, %v665_v28 }
  0xda   : > { %v728_v34 = vpop.f32.mrf.mxu2 }
  0xdb   : > { %v731_v36 = vadd.f32 %v726_v24, %v702_v32 }
  0xdd   : > { %v786_v39 = vadd.f32 %v781_v29, %v731_v36 }
  0xde   : > { %v662_v26 = vpop.f32.mrf.mxu0  ;;  %v783_v38 = vpop.f32.mrf.mxu3 }
  0xdf   : > { %v666_v30 = vadd.f32 %v662_v26, %v611_v27 }
  0xe1   : > { %v703_v33 = vadd.f32 %v699_v31, %v666_v30 }
  0xe3   : > { %v732_v37 = vadd.f32 %v728_v34, %v703_v33 }
  0xe5   : > { %v787_v40 = vadd.f32 %v783_v38, %v732_v37 }
  0xe6   : > { %v818_v35 = vpop.f32.mrf.mxu0 }
  0xe7   : > { %v823_v41 = vadd.f32 %v818_v35, %v786_v39 }
  0xe9   : > { %v836_v44 = vmul.f32 %v823_v41, %v823_v41 }
  0xee   : > { %v820_v42 = vpop.f32.mrf.mxu0 }
  0xef   : > { %v824_v43 = vadd.f32 %v820_v42, %v787_v40 }
  0xf1   : > { %v1100_v45 = vpack.c.bf16 %v824_v43, %v823_v41  ;;  %v829_v46 = vadd.f32 %v824_v43, %v823_v41  ;;  %v837_v47 = vmul.f32 %v824_v43, %v824_v43 }
  0xf3   : > { %1101 = vst [vmem:[%s433_s20] sm:$0xff] %v1100_v45   ;;  %v830_v48 = vrot.slane %v829_v46, 4  ;;  %v838_v50 = vadd.f32 %v837_v47, %v836_v44 }
  0xf5   : > { %v831_v51 = vadd.f32 %v830_v48, %v829_v46  ;;  %v839_v52 = vrot.slane %v838_v50, 4 }
  0xf7   : > { %v832_v53 = vrot.slane %v831_v51, 2  ;;  %v840_v54 = vadd.f32 %v839_v52, %v838_v50 }
  0xf9   : > { %v833_v55 = vadd.f32 %v832_v53, %v831_v51  ;;  %v841_v56 = vrot.slane %v840_v54, 2 }
  0xfa   : > { %v879_v0 = vld [vmem:[%s433_s20] sm:$0xf] (%p1335_p11)  ;;  %v881_v1 = vld [vmem:[%s433_s20 + $0x4] sm:$0xf] (%p1335_p11) }
  0xfb   : > { %v834_v57 = vrot.slane %v833_v55, 1  ;;  %v842_v58 = vadd.f32 %v841_v56, %v840_v54  ;;  %880 = vst [vmem:[%s862_s6] sm:$0xf] (%p1335_p11), %v879_v0 }
  0xfc   : > { %882 = vst [vmem:[%s862_s6 + $0x20] sm:$0xf] (%p1335_p11), %v881_v1 }
  0xfd   : > { %v843_v59 = vrot.slane %v842_v58, 1  ;;  %v835_v60 = vadd.f32 %v834_v57, %v833_v55 }
  0xff   : > { %v844_v61 = vadd.f32 %v843_v59, %v842_v58  ;;  %860 = sbr.rel (!%p1335_p11) target bundleno = 260 (0x104), region = 163 }
 0x101   : > { %v846_v62 = vsel %vm845_vm8, %v835_v60, %v844_v61 }
 0x102   : > { %v848_v63 = vsel %vm847_vm9, %v846_v62, 0.0 }
 0x103   : > { %849 = vst [vmem:[%s445_s18] sm:$0xff] %v848_v63 }
 0x104 PF: > { %s1546_s22 = sld [smem:[#allocation6_spill]]  ;;  %p13_p3 = scmp.ge.s32.totalorder %s1283_s26, 10  }
 0x105   : > { %s1547_s23 = sld [smem:[#allocation7_spill]]  ;;  %s1548_s18 = smov %s1192_s19 }
 0x106   : > { %s1549_s19 = smov %s1324_s15  ;;  %s1550_s20 = smov %s1200_s21 }
 0x107   : > { %s1551_s21 = smov %s1310_s10  ;;  %s1552_s24 = smov %s1283_s26 }
 0x108   :  { %15 = sbr.rel (!%p13_p3) target bundleno = 4 (0x4), region = 271 }

// kernel: resnet_block_forward.4
= control target key start
LH: loop header
LB: loop body
LE: loop exit
PB: predicated region body
PF: predicated region fallthrough
CT: control target
= control target key end

     0   :  { %s1476_s18 = smov 0   ;;  %s1478_s19 = smov 0   ;;  %s1761_s0 = inlined_call_operand.vmem [shape: bf16[2,18,9,8], index: 0, kind: input, shape index: {}, may-alias: {0,1,2}]   ;;  %s1762_s1 = inlined_call_operand.vmem [shape: bf16[2,18,9,8], index: 1, kind: input, shape index: {}, may-alias: {0,1,2}]   ;;  %s1763_s2 = inlined_call_operand.vmem [shape: bf16[2,18,9,8], index: 2, kind: input, shape index: {}, may-alias: {0,1,2}]   ;;  %s1764_s3 = inlined_call_operand.vmem [shape: bf16[9,4,256], index: 3, kind: input, shape index: {}]   ;;  %s1765_s4 = inlined_call_operand.vmem [shape: bf16[2,8,8,256], index: 4, kind: output, shape index: {0}]   ;;  %s1766_s5 = inlined_call_operand.vmem [shape: f32[64,256], index: 5, kind: output, shape index: {1}]  }
   0x1   :  { %s1480_s20 = smov 0   ;;  %s1482_s21 = smov 0  }
   0x2   :  { %s1484_s22 = smov 0   ;;  %s1486_s23 = smov 0  }
   0x3   :  { %s1488_s24 = smov 0   ;;  %s1490_s25 = smov 0  }
   0x4   :  { %s1492_s26 = smov 0  }
   0x5 LB: > { %1768 = sst [smem:[#allocation6_spill]] %s1439_s25  ;;  %s1522_s27 = sadd.s32 4294967295, %s1443_s26   ;;  %s1443_s26 = sphi %s1492_s26, %s1790_s26   ;;  %s1439_s25 = sphi %s1490_s25, %s1783_s25   ;;  %s1435_s24 = sphi %s1488_s24, %s1782_s24   ;;  %s1431_s23 = sphi %s1486_s23, %s1789_s23   ;;  %s1427_s22 = sphi %s1484_s22, %s1788_s22   ;;  %s1423_s21 = sphi %s1482_s21, %s1787_s21   ;;  %s1419_s20 = sphi %s1480_s20, %s1786_s20   ;;  %s1415_s19 = sphi %s1478_s19, %s1785_s19   ;;  %s1411_s18 = sphi %s1476_s18, %s1784_s18  }
   0x6   : > { %s1525_s28 = sadd.s32 1, %s1443_s26   ;;  %s1209_s29 = sshll.u32 %s1443_s26, 1 }
   0x7   : > { %s25_s30 = sadd.s32 1, %s1439_s25  ;;  %s1286_s6 = sadd.s32 2, %s1209_s29 }
   0x8   : > { %p32_p0 = scmp.ne.s32.totalorder %s1439_s25, %s1435_s24  ;;  %s22_s7 = ssub.s32 %s1209_s29, %s1286_s6 }
   0x9   : > { %p33_p1 = scmp.eq.s32.totalorder %s1443_s26, 0  ;;  %p23_p2 = scmp.eq.s32.totalorder %s22_s7, 0 }
   0xa   : > { %s49_s8 = sadd.s32 1, %s1209_s29  ;;  %s51_s10 = sadd.s32 1, %s1286_s6 }
   0xb   : > { %p1534_p3 = por %p33_p1, %p32_p0  ;;  %s52_s12 = ssub.s32 %s49_s8, %s51_s10 }
   0xc   : > { %s1539_s11 = scalar_select %p23_p2, %s1439_s25, %s25_s30  }
   0xd   : > { %s55_s13 = sadd.s32 1, %s1431_s23  ;;  %p53_p4 = scmp.eq.s32.totalorder %s52_s12, 0 }
   0xe   : > { %1770 = sst [smem:[#allocation7_spill]] %s1539_s11  ;;  %p62_p5 = scmp.ne.s32.totalorder %s1431_s23, %s1427_s22 }
   0xf   : > { %s81_s14 = sadd.s32 2, %s1286_s6  ;;  %s85_s15 = sadd.s32 1, %s1423_s21 }
  0x10   : > { %s1546_s16 = scalar_select %p53_p4, %s1431_s23, %s55_s13  }
  0x11   : > { %p1550_p6 = por %p62_p5, %p33_p1  ;;  %s82_s29 = ssub.s32 %s1286_s6, %s81_s14 }
  0x12   : > { %1771 = sst [smem:[#allocation8_spill]] %s1546_s16  ;;  %p83_p7 = scmp.eq.s32.totalorder %s82_s29, 0 }
  0x13   : > { %p92_p8 = scmp.ne.s32.totalorder %s1423_s21, %s1419_s20  ;;  %s129_s30 = ssub.s32 %s1443_s26, %s1525_s28 }
  0x14   : > { %s132_s7 = sadd.s32 1, %s1415_s19  ;;  %p130_p10 = scmp.eq.s32.totalorder %s129_s30, 0 }
  0x15   : > { %s1560_s8 = scalar_select %p83_p7, %s1423_s21, %s85_s15  }
  0x16   : > { %p1564_p9 = por %p92_p8, %p33_p1  ;;  %p142_p11 = scmp.ne.s32.totalorder %s1415_s19, %s1411_s18 }
  0x17   : > { %1773 = sst [smem:[#allocation9_spill]] %s1560_s8  ;;  %p143_p12 = scmp.eq.s32.totalorder %s1522_s27, 7 }
  0x18   : > { %s1572_s12 = scalar_select %p130_p10, %s1415_s19, %s132_s7  }
  0x19   : > { %p1574_p13 = por %p143_p12, %p142_p11  ;;  %p1216_p0 = scmp.ge.s32.totalorder %s1443_s26, 8 }
  0x1a   : > { %1775 = sst [smem:[#allocation10_spill]] %s1572_s12 }
  0x1b   : > { %194 = sbr.rel (%p1216_p0) target bundleno = 50 (0x32), region = 20 }
  0x20   : > { %197 = sbr.rel (!%p1534_p3) target bundleno = 38 (0x26), region = 24  ;;  %s199_s6 = sand.u32 (%p1534_p3), 1, %s1439_s25  }
  0x21   : > { %s1292_s14 = sshll.u32 (%p1534_p3), %s1443_s26, 4  ;;  %s1217_s15 = sshll.u32 (%p1534_p3), %s199_s6, 4 }
  0x22   : > { %s205_s7 = scalar_lea.vmem (%p1534_p3), %s1761_s0, %s1292_s14  ;;  %s201_s11 = scalar_lea.vmem (%p1534_p3), [#allocation2], %s1217_s15 }
  0x23   : > { %v222_v0 = vld [vmem:[%s205_s7] sm:$0xff] (%p1534_p3)   ;;  %v226_v1 = vld [vmem:[%s205_s7 + $0x90] sm:$0xff] (%p1534_p3)  }
  0x24   : > { %223 = vst [vmem:[%s201_s11] sm:$0xff] (%p1534_p3), %v222_v0  }
  0x25   : > { %227 = vst [vmem:[%s201_s11 + $0x8] sm:$0xff] %v226_v1  }
  0x26 PF: > { %261 = sbr.rel (!%p1550_p6) target bundleno = 44 (0x2c), region = 65  ;;  %s263_s9 = sand.u32 (%p1550_p6), 1, %s1431_s23  }
  0x27   : > { %s1293_s16 = sshll.u32 (%p1550_p6), %s1443_s26, 4  ;;  %s1221_s25 = sshll.u32 (%p1550_p6), %s263_s9, 4 }
  0x28   : > { %s1114_s12 = scalar_lea.vmem (%p1550_p6), %s1762_s1, %s1293_s16  ;;  %s265_s14 = scalar_lea.vmem (%p1550_p6), [#allocation3], %s1221_s25 }
  0x29   : > { %v1224_v2 = vld [vmem:[%s1114_s12 + $0x8] sm:$0xff] (%p1550_p6)   ;;  %v1226_v3 = vld [vmem:[%s1114_s12 + $0x98] sm:$0xff] (%p1550_p6)  }
  0x2a   : > { %288 = vst [vmem:[%s265_s14] sm:$0xff] (%p1550_p6), %v1224_v2  }
  0x2b   : > { %292 = vst [vmem:[%s265_s14 + $0x8] sm:$0xff] %v1226_v3  }
  0x2c PF: > { %326 = sbr.rel (!%p1564_p9) target bundleno = 50 (0x32), region = 106  ;;  %s328_s11 = sand.u32 (%p1564_p9), 1, %s1423_s21  }
  0x2d   : > { %s1294_s17 = sshll.u32 (%p1564_p9), %s1443_s26, 4  ;;  %s1228_s15 = sshll.u32 (%p1564_p9), %s328_s11, 4 }
  0x2e   : > { %s1120_s7 = scalar_lea.vmem (%p1564_p9), %s1763_s2, %s1294_s17  ;;  %s330_s16 = scalar_lea.vmem (%p1564_p9), [#allocation4], %s1228_s15 }
  0x2f   : > { %v1231_v4 = vld [vmem:[%s1120_s7 + $0x10] sm:$0xff] (%p1564_p9)   ;;  %v1233_v5 = vld [vmem:[%s1120_s7 + $0xa0] sm:$0xff] (%p1564_p9)  }
  0x30   : > { %353 = vst [vmem:[%s330_s16] sm:$0xff] (%p1564_p9), %v1231_v4  }
  0x31   : > { %357 = vst [vmem:[%s330_s16 + $0x8] sm:$0xff] %v1233_v5  }
  0x32 PF: > { %p1235_p1 = scmp.ge.s32.totalorder %s1443_s26, 1  ;;  %p390_p2 = scmp.lt.s32.totalorder %s1443_s26, 9 }
  0x34   : > { %p391_p3 = pnand %p1235_p1, %p390_p2 }
  0x35   : > { %s397_s25 = sand.u32 (!%p391_p3), 1, %s1435_s24   ;;  %s404_s9 = sand.u32 (!%p391_p3), 1, %s1427_s22  }
  0x36   : > { %394 = sbr.rel (%p391_p3) target bundleno = 397 (0x18d), region = 147  ;;  %s1236_s12 = sshll.u32 (!%p391_p3), %s397_s25, 4 }
  0x37   : > { %s1237_s6 = sshll.u32 (!%p391_p3), %s404_s9, 4  ;;  %s1607_s14 = scalar_lea.vmem (!%p391_p3), [#allocation2], %s1236_s12 }
  0x38   : > { %s411_s26 = sand.u32 (!%p391_p3), 1, %s1419_s20   ;;  %s1445_s17 = smov (!%p391_p3), 124  }
  0x39   : > { %s1238_s11 = sshll.u32 (!%p391_p3), %s411_s26, 4  ;;  %s1619_s29 = scalar_lea.vmem (!%p391_p3), [#allocation3], %s1237_s6 }
  0x3a   : > { %s1612_s24 = scalar_lea.vmem (!%p391_p3), [#allocation4], %s1238_s11  ;;  %p455_p4 = scmp.lt.s32.totalorder (!%p391_p3), %s1522_s27, 7 }
  0x3b   : > { %v1242_v6 = vld [vmem:[%s1764_s3 + $0x4] sm:$0xf]  ;;  %v1245_v7 = vld [vmem:[%s1607_s14] sm:$0xf]  ;;  %v1296_v8 = vld [vmem:[%s1607_s14 + $0x4] sm:$0xf0] }
  0x3c   : > { %484 = vst [vmem:[#allocation1] ss:$4 sm:$0xff] %v1242_v6  ;;  %v1246_v9 = vor.u32 %v1296_v8, %v1245_v7  ;;  %v1270_v10 = vld [vmem:[%s1612_s24] sm:$0xf]  ;;  %v1298_v11 = vld [vmem:[%s1612_s24 + $0x4] sm:$0xf0] }
  0x3d   : > { %v473_v12 = vld [vmem:[%s1764_s3] sm:$0xf]  ;;  %v1257_v13 = vld [vmem:[%s1619_s29] sm:$0xf]  ;;  %v1623_v15 = vor.u32 %v1298_v11, %v1270_v10  ;;  %vm491_vm0 = vcmask 1041408   ;;  %vm487_vm1 = vcmask 31744  }
  0x3e   : > { %481 = vrot.lane.b32.xlu0 %v1246_v9, %s1445_s17  ;;  %v1297_v14 = vld [vmem:[%s1619_s29 + $0x4] sm:$0xf0]  ;;  %v1251_v21 = vld [vmem:[%s1764_s3 + $0x8] sm:$0xf]  ;;  %v1254_v30 = vld [vmem:[%s1764_s3 + $0xc] sm:$0xf] }
  0x3f   : > { %867 = vrot.lane.b32.xlu1 %v1623_v15, %s1445_s17  ;;  %v1258_v20 = vor.u32 %v1297_v14, %v1257_v13  ;;  %v1261_v31 = vld [vmem:[%s1764_s3 + $0x10] sm:$0xf]  ;;  %v461_v36 = vld [vmem:[%s1607_s14] sm:$0xf]  ;;  %v1264_v40 = vld [vmem:[%s1764_s3 + $0x14] sm:$0xf] }
  0x40   : > { %v463_v37 = vld [vmem:[%s1607_s14 + $0x8] sm:$0xf]  ;;  %v465_v38 = vld [vmem:[%s1619_s29] sm:$0xf]  ;;  %v567_v46 = vshrl.u32 %v461_v36, 16  ;;  %v570_v48 = vshll.u32 %v461_v36, 16 }
  0x41   : > { %v467_v39 = vld [vmem:[%s1619_s29 + $0x8] sm:$0xf]  ;;  %v740_v41 = vshrl.u32 %v465_v38, 16  ;;  %v743_v42 = vshll.u32 %v465_v38, 16  ;;  %v466_v47 = vld [vmem:[%s1619_s29 + $0x4] sm:$0x1] }
  0x42   : > { %v754_v43 = vshrl.u32 %v467_v39, 16  ;;  %v468_v49 = vld [vmem:[%s1619_s29 + $0xc] sm:$0x1]  ;;  %v749_v52 = vshll.u32 %v466_v47, 16  ;;  %v581_v53 = vshrl.u32 %v463_v37, 16  ;;  %v757_v55 = vshll.u32 %v467_v39, 16 }
  0x43   : > { %v485_v16 = vld.sshfl [vmem:[#allocation1] sm:$0xff pattern:$0x73625140]  ;;  %v486_v17 = vld.sshfl [vmem:[#allocation1 + $0x8] sm:$0xff pattern:$0x73625140] }
  0x44   : > { %525 = vst [vmem:[#allocation1] ss:$4 sm:$0xff] %v473_v12  ;;  %v492_v18 = vsel %vm491_vm0, %v485_v16, 0  ;;  %v494_v19 = vsel %vm491_vm0, %v486_v17, 0  ;;  %v742_v50 = vrot.slane %v740_v41, 4  ;;  %v745_v51 = vrot.slane %v743_v42, 5 }
  0x45   : > { %503 = vmatpush.bf16.msra.mxu0 %v492_v18  ;;  %517 = vmatpush.bf16.msra.mxu1 %v494_v19  ;;  %v756_v54 = vrot.slane %v754_v43, 4  ;;  %v763_v56 = vshll.u32 %v468_v49, 16  ;;  %vm563_vm2 = vsmask.f32 3328  ;;  %vm564_vm3 = vsmask.f32 7440 }
  0x46   : > { %694 = vrot.lane.b32.xlu0 %v1258_v20, %s1445_s17  ;;  %v746_v57 = vor.u32 %v745_v51, %v742_v50  ;;  %v751_v58 = vrot.slane %v749_v52, 5  ;;  %v584_v59 = vshll.u32 %v463_v37, 16  ;;  %v759_v60 = vrot.slane %v757_v55, 5  ;;  %vm1656_vm4 = vmor %vm563_vm2, %vm564_vm3  ;;  %v1267_v4 = vld [vmem:[%s1764_s3 + $0x18] sm:$0xf]  ;;  %s1299_s16 = sshll.u32 (%p1574_p13), %s1522_s27, 3 }
  0x47   : > { %v569_v61 = vrot.slane %v567_v46, 4  ;;  %v572_v0 = vrot.slane %v570_v48, 5  ;;  %v583_v1 = vrot.slane %v581_v53, 4  ;;  %v765_v3 = vrot.slane %v763_v56, 5  ;;  %v462_v12 = vld [vmem:[%s1607_s14 + $0x4] sm:$0x1]  ;;  %s1045_s10 = scalar_lea.vmem (%p1574_p13), %s1765_s4, %s1299_s16 }
  0x48   : > { %v747_v62 = vrot.slane %v746_v57, 4  ;;  %v760_v2 = vor.u32 %v759_v60, %v756_v54  ;;  %v586_v8 = vrot.slane %v584_v59, 5  ;;  %v464_v13 = vld [vmem:[%s1607_s14 + $0xc] sm:$0x1]  ;;  %v576_v19 = vshll.u32 %v462_v12, 16 }
  0x49   : > { %v573_v18 = vor.u32 %v572_v0, %v569_v61  ;;  %v469_v51 = vld [vmem:[%s1612_s24] sm:$0xf]  ;;  %v471_v52 = vld [vmem:[%s1612_s24 + $0x8] sm:$0xf]  ;;  %v470_v61 = vld [vmem:[%s1612_s24 + $0x4] sm:$0x1] }
  0x4a   : > { %v752_v7 = vsel %vm1656_vm4, %v747_v62, %v751_v58  ;;  %v761_v11 = vrot.slane %v760_v2, 4  ;;  %v913_v53 = vshrl.u32 %v469_v51, 16  ;;  %v916_v54 = vshll.u32 %v469_v51, 16  ;;  %v472_v62 = vld [vmem:[%s1612_s24 + $0xc] sm:$0x1]  ;;  %s440_s24 = sand.u32 1, %s1411_s18  }
  0x4b   : > { %v526_v22 = vld.sshfl [vmem:[#allocation1] sm:$0xff pattern:$0x73625140]  ;;  %v527_v23 = vld.sshfl [vmem:[#allocation1 + $0x8] sm:$0xff pattern:$0x73625140]  ;;  %v769_v14 = vunpack.c.l.b16 %v752_v7 }
  0x4c   : > { %v531_v24 = vsel %vm491_vm0, %v526_v22, 0  ;;  %v533_v25 = vsel %vm491_vm0, %v527_v23, 0  ;;  %600 = vst [vmem:[#allocation1] ss:$4 sm:$0xff] %v1251_v21  ;;  %v766_v16 = vsel %vm1656_vm4, %v761_v11, %v765_v3  ;;  %v590_v21 = vshll.u32 %v464_v13, 16  ;;  %s1239_s22 = sshll.u32 %s440_s24, 4 }
  0x4d   : > { %542 = vmatpush.bf16.msra.mxu2 %v531_v24  ;;  %556 = vmatpush.bf16.msra.mxu3 %v533_v25  ;;  %v770_v17 = vunpack.c.l.b16 %v766_v16  ;;  %v927_v55 = vshrl.u32 %v471_v52, 16  ;;  %v930_v56 = vshll.u32 %v471_v52, 16  ;;  %v915_v57 = vrot.slane %v913_v53, 4  ;;  %s1714_s15 = scalar_lea.vmem [#allocation5], %s1239_s22 }
  0x4e   : > { %v918_v58 = vrot.slane %v916_v54, 5  ;;  %v936_v3 = vshll.u32 %v472_v62, 16  ;;  %s456_s18 = scalar_select %p455_p4, %s1522_s27, 7  ;;  %vm1024_vm5 = vcmask 1040384  }
  0x4f   : > { %v771_v24 = vpack.c.b16 %v770_v17, %v769_v14  ;;  %v929_v59 = vrot.slane %v927_v55, 4  ;;  %v932_v60 = vrot.slane %v930_v56, 5 }
  0x50   : > { %1249 = vmatmul.msk.bf16.vlgmr.msra.gmra.mxu2 %vm487_vm1, %v1246_v9  ;;  %1250 = vmatmul.msk.bf16.vlgmr.msra.gmra.mxu3 %vm487_vm1, %v1246_v9  ;;  %v919_v0 = vor.u32 %v918_v58, %v915_v57  ;;  %v938_v7 = vrot.slane %v936_v3, 5  ;;  %s1295_s29 = sshll.u32 %s456_s18, 4 }
  0x51   : > { %v933_v2 = vor.u32 %v932_v60, %v929_v59  ;;  %s459_s7 = scalar_lea.vmem %s1766_s5, %s1295_s29 }
  0x53   : > { %v601_v26 = vld.sshfl [vmem:[#allocation1] sm:$0xff pattern:$0x73625140]  ;;  %v602_v27 = vld.sshfl [vmem:[#allocation1 + $0x8] sm:$0xff pattern:$0x73625140] }
  0x54   : > { %v606_v28 = vsel %vm491_vm0, %v601_v26, 0  ;;  %v608_v29 = vsel %vm491_vm0, %v602_v27, 0  ;;  %650 = vst [vmem:[#allocation1] ss:$4 sm:$0xff] %v1254_v30  ;;  %v1274_v26 = vld [vmem:[%s1764_s3 + $0x1c] sm:$0xf] }
  0x55   : > { %617 = vmatpush.bf16.msrb.mxu0 %v606_v28  ;;  %631 = vmatpush.bf16.msrb.mxu1 %v608_v29  ;;  %v574_v29 = vrot.slane %v573_v18, 4  ;;  %v578_v30 = vrot.slane %v576_v19, 5 }
  0x5b   : > { %v651_v32 = vld.sshfl [vmem:[#allocation1] sm:$0xff pattern:$0x73625140]  ;;  %v652_v33 = vld.sshfl [vmem:[#allocation1 + $0x8] sm:$0xff pattern:$0x73625140] }
  0x5c   : > { %v656_v34 = vsel %vm491_vm0, %v651_v32, 0  ;;  %v658_v35 = vsel %vm491_vm0, %v652_v33, 0  ;;  %697 = vst [vmem:[#allocation1] ss:$4 sm:$0xff] %v1261_v31  ;;  %v592_v32 = vrot.slane %v590_v21, 5  ;;  %v579_v33 = vsel %vm1656_vm4, %v574_v29, %v578_v30 }
  0x5d   : > { %667 = vmatpush.bf16.msrb.mxu2 %v656_v34  ;;  %681 = vmatpush.bf16.msrb.mxu3 %v658_v35  ;;  %v596_v35 = vunpack.c.l.b16 %v579_v33 }
  0x60   : > { %1259 = vmatmul.msk.bf16.vlgmr.msrb.gmra.mxu2 %vm487_vm1, %v1258_v20  ;;  %1260 = vmatmul.msk.bf16.vlgmr.msrb.gmra.mxu3 %vm487_vm1, %v1258_v20  ;;  %v587_v20 = vor.u32 %v586_v8, %v583_v1  ;;  %v922_v1 = vshll.u32 %v470_v61, 16 }
  0x62   : > { %v588_v31 = vrot.slane %v587_v20, 4 }
  0x63   : > { %v698_v44 = vld.sshfl [vmem:[#allocation1] sm:$0xff pattern:$0x73625140]  ;;  %v699_v45 = vld.sshfl [vmem:[#allocation1 + $0x8] sm:$0xff pattern:$0x73625140] }
  0x64   : > { %773 = vst [vmem:[#allocation1] ss:$4 sm:$0xff] %v1264_v40  ;;  %v703_v22 = vsel %vm491_vm0, %v698_v44, 0  ;;  %v705_v23 = vsel %vm491_vm0, %v699_v45, 0  ;;  %v593_v34 = vsel %vm1656_vm4, %v588_v31, %v592_v32  ;;  %v1277_v45 = vld [vmem:[%s1764_s3 + $0x20] sm:$0xf] }
  0x65   : > { %v597_v36 = vunpack.c.l.b16 %v593_v34 }
  0x67   : > { %v598_v41 = vpack.c.b16 %v597_v36, %v596_v35 }
  0x6b   : > { %v774_v5 = vld.sshfl [vmem:[#allocation1] sm:$0xff pattern:$0x73625140]  ;;  %v775_v6 = vld.sshfl [vmem:[#allocation1 + $0x8] sm:$0xff pattern:$0x73625140] }
  0x6c   : > { %v779_v9 = vsel %vm491_vm0, %v774_v5, 0  ;;  %v781_v10 = vsel %vm491_vm0, %v775_v6, 0  ;;  %823 = vst [vmem:[#allocation1] ss:$4 sm:$0xff] %v1267_v4  ;;  %v920_v4 = vrot.slane %v919_v0, 4  ;;  %v924_v5 = vrot.slane %v922_v1, 5 }
  0x6d   : > { %790 = vmatpush.bf16.msra.mxu2 %v779_v9  ;;  %804 = vmatpush.bf16.msra.mxu3 %v781_v10  ;;  %v934_v6 = vrot.slane %v933_v2, 4 }
  0x6e   : > { %v925_v8 = vsel %vm1656_vm4, %v920_v4, %v924_v5 }
  0x6f   : > { %v939_v9 = vsel %vm1656_vm4, %v934_v6, %v938_v7  ;;  %v942_v10 = vunpack.c.l.b16 %v925_v8 }
  0x70   : > { %1265 = vmatmul.msk.bf16.vlgmr.msra.gmra.mxu2 %vm487_vm1, %v771_v24  ;;  %1266 = vmatmul.msk.bf16.vlgmr.msra.gmra.mxu3 %vm487_vm1, %v771_v24  ;;  %v943_v11 = vunpack.c.l.b16 %v939_v9 }
  0x72   : > { %v944_v12 = vpack.c.b16 %v943_v11, %v942_v10 }
  0x73   : > { %v824_v27 = vld.sshfl [vmem:[#allocation1] sm:$0xff pattern:$0x73625140]  ;;  %v825_v28 = vld.sshfl [vmem:[#allocation1 + $0x8] sm:$0xff pattern:$0x73625140] }
  0x74   : > { %870 = vst [vmem:[#allocation1] ss:$4 sm:$0xff] %v1274_v26  ;;  %v829_v42 = vsel %vm491_vm0, %v824_v27, 0  ;;  %v831_v43 = vsel %vm491_vm0, %v825_v28, 0 }
  0x7b   : > { %v871_v37 = vld.sshfl [vmem:[#allocation1] sm:$0xff pattern:$0x73625140]  ;;  %v872_v38 = vld.sshfl [vmem:[#allocation1 + $0x8] sm:$0xff pattern:$0x73625140] }
  0x7c   : > { %v876_v39 = vsel %vm491_vm0, %v871_v37, 0  ;;  %v878_v40 = vsel %vm491_vm0, %v872_v38, 0  ;;  %946 = vst [vmem:[#allocation1] ss:$4 sm:$0xff] %v1277_v45 }
  0x7d   : > { %887 = vmatpush.bf16.msrb.mxu2 %v876_v39  ;;  %901 = vmatpush.bf16.msrb.mxu3 %v878_v40 }
  0x83   : > { %v947_v46 = vld.sshfl [vmem:[#allocation1] sm:$0xff pattern:$0x73625140]  ;;  %v948_v47 = vld.sshfl [vmem:[#allocation1 + $0x8] sm:$0xff pattern:$0x73625140] }
  0x84   : > { %v952_v49 = vsel %vm491_vm0, %v947_v46, 0  ;;  %v954_v50 = vsel %vm491_vm0, %v948_v47, 0 }
  0xb0   : > { %v482_v25 = vpop.permute.xlu0 %481 }
  0xb1   : > { %1247 = vmatmul.msk.bf16.vlgmr.msra.gmra.mxu0 %vm487_vm1, %v482_v25  ;;  %1248 = vmatmul.msk.bf16.vlgmr.msra.gmra.mxu1 %vm487_vm1, %v482_v25  ;;  %v868_v44 = vpop.permute.xlu1 %867 }
  0xb2   : > { %714 = vmatpush.bf16.msra.mxu0 %v703_v22  ;;  %728 = vmatpush.bf16.msra.mxu1 %v705_v23 }
  0xb3   : > { %1275 = vmatmul.msk.bf16.vlgmr.msrb.gmra.mxu2 %vm487_vm1, %v868_v44  ;;  %1276 = vmatmul.msk.bf16.vlgmr.msrb.gmra.mxu3 %vm487_vm1, %v868_v44 }
  0xb8   : > { %v695_v48 = vpop.permute.xlu0 %694 }
  0xc1   : > { %1252 = vmatmul.msk.bf16.vlgmr.msrb.gmra.mxu0 %vm487_vm1, %v598_v41  ;;  %1253 = vmatmul.msk.bf16.vlgmr.msrb.gmra.mxu1 %vm487_vm1, %v598_v41 }
  0xc2   : > { %840 = vmatpush.bf16.msrb.mxu0 %v829_v42  ;;  %854 = vmatpush.bf16.msrb.mxu1 %v831_v43 }
  0xd1   : > { %1262 = vmatmul.msk.bf16.vlgmr.msra.gmra.mxu0 %vm487_vm1, %v695_v48  ;;  %1263 = vmatmul.msk.bf16.vlgmr.msra.gmra.mxu1 %vm487_vm1, %v695_v48 }
  0xd2   : > { %963 = vmatpush.bf16.msra.mxu0 %v952_v49  ;;  %977 = vmatpush.bf16.msra.mxu1 %v954_v50 }
  0xd3   : > { %v544_v13 = vpop.f32.mrf.mxu2  ;;  %v558_v14 = vpop.f32.mrf.mxu3 }
  0xdb   : > { %v546_v19 = vpop.f32.mrf.mxu2  ;;  %v560_v20 = vpop.f32.mrf.mxu3 }
  0xe1   : > { %1272 = vmatmul.msk.bf16.vlgmr.msrb.gmra.mxu0 %vm487_vm1, %v1623_v15  ;;  %1273 = vmatmul.msk.bf16.vlgmr.msrb.gmra.mxu1 %vm487_vm1, %v1623_v15 }
  0xe3   : > { %v669_v23 = vpop.f32.mrf.mxu2  ;;  %v683_v63 = vpop.f32.mrf.mxu3 }
  0xeb   : > { %v671_v26 = vpop.f32.mrf.mxu2  ;;  %v685_v27 = vpop.f32.mrf.mxu3 }
  0xf1   : > { %1278 = vmatmul.msk.bf16.vlgmr.msra.gmra.mxu0 %vm487_vm1, %v944_v12  ;;  %1279 = vmatmul.msk.bf16.vlgmr.msra.gmra.mxu1 %vm487_vm1, %v944_v12 }
  0xf3   : > { %v792_v30 = vpop.f32.mrf.mxu2  ;;  %v806_v31 = vpop.f32.mrf.mxu3 }
  0xfb   : > { %v794_v38 = vpop.f32.mrf.mxu2  ;;  %v808_v39 = vpop.f32.mrf.mxu3 }
 0x12e   : > { %v505_v15 = vpop.f32.mrf.mxu0  ;;  %v519_v16 = vpop.f32.mrf.mxu1 }
 0x12f   : > { %v545_v34 = vadd.f32 %v544_v13, %v505_v15  ;;  %v559_v35 = vadd.f32 %v558_v14, %v519_v16 }
 0x136   : > { %v507_v17 = vpop.f32.mrf.mxu0  ;;  %v521_v18 = vpop.f32.mrf.mxu1 }
 0x137   : > { %v547_v44 = vadd.f32 %v546_v19, %v507_v17  ;;  %v561_v45 = vadd.f32 %v560_v20, %v521_v18  ;;  %v889_v54 = vpop.f32.mrf.mxu2  ;;  %v903_v55 = vpop.f32.mrf.mxu3 }
 0x13e   : > { %v619_v21 = vpop.f32.mrf.mxu0  ;;  %v633_v22 = vpop.f32.mrf.mxu1 }
 0x13f   : > { %v638_v36 = vadd.f32 %v619_v21, %v545_v34  ;;  %v639_v37 = vadd.f32 %v633_v22, %v559_v35  ;;  %v891_v10 = vpop.f32.mrf.mxu2  ;;  %v905_v11 = vpop.f32.mrf.mxu3 }
 0x141   : > { %v688_v42 = vadd.f32 %v669_v23, %v638_v36  ;;  %v689_v43 = vadd.f32 %v683_v63, %v639_v37 }
 0x146   : > { %v621_v24 = vpop.f32.mrf.mxu0  ;;  %v635_v25 = vpop.f32.mrf.mxu1 }
 0x147   : > { %v640_v48 = vadd.f32 %v621_v24, %v547_v44  ;;  %v641_v49 = vadd.f32 %v635_v25, %v561_v45 }
 0x149   : > { %v690_v56 = vadd.f32 %v671_v26, %v640_v48  ;;  %v691_v57 = vadd.f32 %v685_v27, %v641_v49 }
 0x14e   : > { %v716_v28 = vpop.f32.mrf.mxu0  ;;  %v730_v29 = vpop.f32.mrf.mxu1 }
 0x14f   : > { %v735_v46 = vadd.f32 %v716_v28, %v688_v42  ;;  %v736_v47 = vadd.f32 %v730_v29, %v689_v43 }
 0x151   : > { %v811_v52 = vadd.f32 %v792_v30, %v735_v46  ;;  %v812_v53 = vadd.f32 %v806_v31, %v736_v47 }
 0x156   : > { %v718_v32 = vpop.f32.mrf.mxu0  ;;  %v732_v33 = vpop.f32.mrf.mxu1 }
 0x157   : > { %v737_v60 = vadd.f32 %v718_v32, %v690_v56  ;;  %v738_v61 = vadd.f32 %v732_v33, %v691_v57 }
 0x159   : > { %v813_v3 = vadd.f32 %v794_v38, %v737_v60  ;;  %v814_v4 = vadd.f32 %v808_v39, %v738_v61 }
 0x15e   : > { %v842_v40 = vpop.f32.mrf.mxu0  ;;  %v856_v41 = vpop.f32.mrf.mxu1 }
 0x15f   : > { %v861_v58 = vadd.f32 %v842_v40, %v811_v52  ;;  %v862_v59 = vadd.f32 %v856_v41, %v812_v53 }
 0x161   : > { %v908_v62 = vadd.f32 %v889_v54, %v861_v58  ;;  %v909_v0 = vadd.f32 %v903_v55, %v862_v59 }
 0x166   : > { %v844_v50 = vpop.f32.mrf.mxu0  ;;  %v858_v51 = vpop.f32.mrf.mxu1 }
 0x167   : > { %v863_v7 = vadd.f32 %v844_v50, %v813_v3  ;;  %v864_v8 = vadd.f32 %v858_v51, %v814_v4 }
 0x169   : > { %v910_v12 = vadd.f32 %v891_v10, %v863_v7  ;;  %v911_v13 = vadd.f32 %v905_v11, %v864_v8 }
 0x16e   : > { %v965_v1 = vpop.f32.mrf.mxu0  ;;  %v979_v2 = vpop.f32.mrf.mxu1 }
 0x16f   : > { %v984_v5 = vadd.f32 %v965_v1, %v908_v62  ;;  %v985_v6 = vadd.f32 %v979_v2, %v909_v0 }
 0x171   : > { %v988_v9 = vpack.c.bf16 %v985_v6, %v984_v5  ;;  %v1006_v18 = vmul.f32 %v984_v5, %v984_v5  ;;  %v1007_v23 = vmul.f32 %v985_v6, %v985_v6 }
 0x173   : > { %990 = vst [vmem:[%s1714_s15] sm:$0xff] %v988_v9 }
 0x176   : > { %v967_v14 = vpop.f32.mrf.mxu0  ;;  %v981_v15 = vpop.f32.mrf.mxu1 }
 0x177   : > { %v986_v16 = vadd.f32 %v967_v14, %v910_v12  ;;  %v987_v17 = vadd.f32 %v981_v15, %v911_v13 }
 0x179   : > { %v992_v19 = vadd.f32 %v986_v16, %v984_v5  ;;  %v1008_v20 = vmul.f32 %v986_v16, %v986_v16  ;;  %v989_v21 = vpack.c.bf16 %v987_v17, %v986_v16  ;;  %v999_v22 = vadd.f32 %v987_v17, %v985_v6 }
 0x17a   : > { %v1009_v63 = vmul.f32 %v987_v17, %v987_v17  ;;  %v1076_v54 = vld [vmem:[%s1714_s15] sm:$0xff] (%p1574_p13) }
 0x17b   : > { %v993_v24 = vrot.slane %v992_v19, 4  ;;  %v1010_v25 = vadd.f32 %v1008_v20, %v1006_v18  ;;  %991 = vst [vmem:[%s1714_s15 + $0x8] sm:$0xff] %v989_v21  ;;  %v1000_v26 = vrot.slane %v999_v22, 4 }
 0x17c   : > { %v1017_v27 = vadd.f32 %v1009_v63, %v1007_v23  ;;  %1077 = vst [vmem:[%s1045_s10] sm:$0xff] (%p1574_p13), %v1076_v54 }
 0x17d   : > { %v994_v28 = vadd.f32 %v993_v24, %v992_v19  ;;  %v1011_v29 = vrot.slane %v1010_v25, 4  ;;  %v1001_v30 = vadd.f32 %v1000_v26, %v999_v22 }
 0x17e   : > { %v1018_v31 = vrot.slane %v1017_v27, 4 }
 0x17f   : > { %v995_v32 = vrot.slane %v994_v28, 2  ;;  %v1012_v33 = vadd.f32 %v1011_v29, %v1010_v25  ;;  %v1002_v34 = vrot.slane %v1001_v30, 2 }
 0x180   : > { %v1019_v35 = vadd.f32 %v1018_v31, %v1017_v27 }
 0x181   : > { %v996_v36 = vadd.f32 %v995_v32, %v994_v28  ;;  %v1013_v37 = vrot.slane %v1012_v33, 2  ;;  %v1003_v38 = vadd.f32 %v1002_v34, %v1001_v30 }
 0x182   : > { %v1020_v39 = vrot.slane %v1019_v35, 2  ;;  %v1078_v55 = vld [vmem:[%s1714_s15 + $0x8] sm:$0xff] (%p1574_p13) }
 0x183   : > { %v997_v40 = vrot.slane %v996_v36, 1  ;;  %v1014_v41 = vadd.f32 %v1013_v37, %v1012_v33  ;;  %v1004_v42 = vrot.slane %v1003_v38, 1  ;;  %1079 = vst [vmem:[%s1045_s10 + $0x40] sm:$0xff] (%p1574_p13), %v1078_v55 }
 0x184   : > { %v1021_v43 = vadd.f32 %v1020_v39, %v1019_v35 }
 0x185   : > { %v1015_v44 = vrot.slane %v1014_v41, 1  ;;  %v998_v46 = vadd.f32 %v997_v40, %v996_v36  ;;  %v1005_v48 = vadd.f32 %v1004_v42, %v1003_v38 }
 0x186   : > { %v1022_v45 = vrot.slane %v1021_v43, 1 }
 0x187   : > { %v1016_v47 = vadd.f32 %v1015_v44, %v1014_v41 }
 0x188   : > { %v1023_v49 = vadd.f32 %v1022_v45, %v1021_v43  ;;  %1042 = sbr.rel (!%p1574_p13) target bundleno = 397 (0x18d), region = 163 }
 0x189   : > { %v1025_v50 = vsel %vm1024_vm5, %v998_v46, %v1016_v47 }
 0x18a   : > { %v1027_v51 = vsel %vm491_vm0, %v1025_v50, 0.0  ;;  %v1026_v52 = vsel %vm1024_vm5, %v1005_v48, %v1023_v49 }
 0x18b   : > { %1029 = vst [vmem:[%s459_s7] sm:$0xff] %v1027_v51  ;;  %v1028_v53 = vsel %vm491_vm0, %v1026_v52, 0.0 }
 0x18c   : > { %1030 = vst [vmem:[%s459_s7 + $0x8] sm:$0xff] %v1028_v53 }
 0x18d PF: > { %s1779_s12 = sld [smem:[#allocation10_spill]]  ;;  %p13_p5 = scmp.ge.s32.totalorder %s1525_s28, 10  }
 0x18e   : > { %s1780_s13 = sld [smem:[#allocation9_spill]]  ;;  %s1784_s18 = smov %s1415_s19 }
 0x18f   : > { %s1781_s9 = sld [smem:[#allocation8_spill]]  ;;  %s1786_s20 = smov %s1423_s21 }
 0x190   : > { %s1782_s24 = sld [smem:[#allocation6_spill]]  ;;  %s1788_s22 = smov %s1431_s23 }
 0x191   : > { %s1783_s25 = sld [smem:[#allocation7_spill]]  ;;  %s1790_s26 = smov %s1525_s28 }
 0x192   :  { %15 = sbr.rel (!%p13_p5) target bundleno = 5 (0x5), region = 268 }
 0x193   : > { %s1785_s19 = smov %s1779_s12 }
 0x194   : > { %s1787_s21 = smov %s1780_s13 }
 0x195   : > { %s1789_s23 = smov %s1781_s9 }

</bundles_post_ra>
